<compile_context>
chip_gen: v5e
topology: v5e:2x2
jax: 0.10.0
libtpu: 0.0.40
codegen_flags: <defaults>
</compile_context>

<pallas_src>
import jax
import jax.numpy as jnp
from jax.experimental import pallas as pl
from jax.experimental.pallas import tpu as pltpu

# ---- dimensions implied by the module -------------------------------------
IMG_FEAT = 1280      # efficientnet_v2_m feature size (classifier truncated at Dropout)
TXT_FEAT = 768       # DistilBERT hidden size
GATED_HID = 256      # self.gated_output_hidden_size
N_CLASSES = 4        # n_classes constructor arg (small demo value)
OUT_PAD = 128        # lane-dense padded classifier width (>= N_CLASSES, multiple of 128)
MAX_TILE_B = 128     # max batch rows per grid step (MXU-friendly)

BATCH = 16           # small demo batch
SEQ = 8              # token sequence length for the demo
VOCAB = 1000         # surrogate vocab


# ---------------------------------------------------------------------------
# Pallas kernel: gated multimodal fusion head (one batch tile per grid step)
# ---------------------------------------------------------------------------
def gated_fusion_kernel(img_ref, txt_ref,
                        w_img_ref, b_img_ref,
                        w_txt_ref, b_txt_ref,
                        w_z_img_ref, w_z_txt_ref, b_z_ref,
                        w_fc_ref, b_fc_ref,
                        out_ref):
    img = img_ref[...]                                    # (TILE_B, 1280) bf16
    txt = txt_ref[...]                                    # (TILE_B, 768)  bf16

    # image_features_hidden_layer / text_features_hidden_layer (Linear)
    img_hid = (jnp.dot(img, w_img_ref[...],
                       preferred_element_type=jnp.float32) + b_img_ref[...])
    txt_hid = (jnp.dot(txt, w_txt_ref[...],
                       preferred_element_type=jnp.float32) + b_txt_ref[...])

    # hyper_tang_layer (kept in f32 on the VPU/EUP — v5e has no bf16 VPU)
    img_tanh = jnp.tanh(img_hid)
    txt_tanh = jnp.tanh(txt_hid)

    # z_layer applied to cat([img_hid, txt_hid], dim=1) — PRE-tanh, as in the
    # PyTorch forward.  The (512 -> 256) weight is split into two (256 -> 256)
    # halves so no concat is materialized in VMEM.
    z_pre = (jnp.dot(img_hid.astype(jnp.bfloat16), w_z_img_ref[...],
                     preferred_element_type=jnp.float32)
             + jnp.dot(txt_hid.astype(jnp.bfloat16), w_z_txt_ref[...],
                       preferred_element_type=jnp.float32)
             + b_z_ref[...])

    # softmax_layer (dim=1), numerically stable; reciprocal goes to the EUP.
    z_max = jnp.max(z_pre, axis=1, keepdims=True)
    z_exp = jnp.exp(z_pre - z_max)
    denom = jnp.sum(z_exp, axis=1, keepdims=True)
    z = z_exp * pl.reciprocal(denom, approx=True)

    # gated blend: z*img_tanh + (1-z)*txt_tanh, rewritten with one fewer vmul.
    gate = txt_tanh + z * (img_tanh - txt_tanh)

    # TODO(synk): nn.Dropout(p=drop_ratio) is stochastic in train mode; treated
    # as identity here (eval semantics).

    # fc_layer_gated — weight zero-padded to OUT_PAD lanes -> unmasked stores.
    out_ref[...] = (jnp.dot(gate.astype(jnp.bfloat16), w_fc_ref[...],
                            preferred_element_type=jnp.float32)
                    + b_fc_ref[...])


def gated_forward(img_feat, txt_feat, params):
    """Gated fusion head as a batch-tiled Pallas kernel."""
    B = img_feat.shape[0]
    # Sublane-aligned batch tile: full MXU tile for big batches, minimal padding
    # for small demo batches.
    b_round8 = int(pl.cdiv(B, 8)) * 8
    tile_b = MAX_TILE_B if b_round8 >= MAX_TILE_B else b_round8
    n_tiles = int(pl.cdiv(B, tile_b))
    b_pad = n_tiles * tile_b
    pad_rows = b_pad - B

    # bf16 activations / weights for the MXU + halved HBM traffic.
    img_b = jnp.pad(img_feat, ((0, pad_rows), (0, 0))).astype(jnp.bfloat16)
    txt_b = jnp.pad(txt_feat, ((0, pad_rows), (0, 0))).astype(jnp.bfloat16)

    w_img = params["w_img"].astype(jnp.bfloat16)
    w_txt = params["w_txt"].astype(jnp.bfloat16)
    w_z_img = params["w_z_img"].astype(jnp.bfloat16)
    w_z_txt = params["w_z_txt"].astype(jnp.bfloat16)
    w_fc = jnp.pad(params["w_fc"],
                   ((0, 0), (0, OUT_PAD - N_CLASSES))).astype(jnp.bfloat16)
    b_fc = jnp.pad(params["b_fc"], ((0, 0), (0, OUT_PAD - N_CLASSES)))

    def batch_spec(feat_dim):
        return pl.BlockSpec((tile_b, feat_dim), lambda i: (i, 0))

    def resident_spec(shape):
        # Same block for every grid step -> weight stays resident in VMEM.
        return pl.BlockSpec(shape, lambda i: (0, 0))

    out = pl.pallas_call(
        gated_fusion_kernel,
        out_shape=jax.ShapeDtypeStruct((b_pad, OUT_PAD), jnp.float32),
        grid=(n_tiles,),
        in_specs=[
            batch_spec(IMG_FEAT),                       # img features
            batch_spec(TXT_FEAT),                       # txt features
            resident_spec((IMG_FEAT, GATED_HID)),       # w_img
            resident_spec((1, GATED_HID)),              # b_img
            resident_spec((TXT_FEAT, GATED_HID)),       # w_txt
            resident_spec((1, GATED_HID)),              # b_txt
            resident_spec((GATED_HID, GATED_HID)),      # w_z (image half)
            resident_spec((GATED_HID, GATED_HID)),      # w_z (text half)
            resident_spec((1, GATED_HID)),              # b_z
            resident_spec((GATED_HID, OUT_PAD)),        # w_fc (padded)
            resident_spec((1, OUT_PAD)),                # b_fc (padded)
        ],
        out_specs=pl.BlockSpec((tile_b, OUT_PAD), lambda i: (i, 0)),
        compiler_params=pltpu.CompilerParams(
            dimension_semantics=("parallel",)),
    )(img_b, txt_b,
      w_img, params["b_img"],
      w_txt, params["b_txt"],
      w_z_img, w_z_txt, params["b_z"],
      w_fc, b_fc)

    return out[:B, :N_CLASSES]


# ---------------------------------------------------------------------------
# Deterministic parameter / surrogate-backbone setup (plain JAX glue)
# ---------------------------------------------------------------------------
def init_params(key):
    ks = jax.random.split(key, 12)

    def lin(k, fan_in, fan_out):
        scale = 1.0 / jnp.sqrt(jnp.float32(fan_in))
        return jax.random.uniform(k, (fan_in, fan_out), jnp.float32,
                                  -scale, scale)

    params = {
        # image_features_hidden_layer: Linear(1280, 256)
        "w_img": lin(ks[0], IMG_FEAT, GATED_HID),
        "b_img": jax.random.normal(ks[1], (1, GATED_HID), jnp.float32) * 0.01,
        # text_features_hidden_layer: Linear(768, 256)
        "w_txt": lin(ks[2], TXT_FEAT, GATED_HID),
        "b_txt": jax.random.normal(ks[3], (1, GATED_HID), jnp.float32) * 0.01,
        # z_layer: Linear(512, 256)  (split into image-half / text-half rows)
        "w_z_img": lin(ks[4], GATED_HID, GATED_HID),
        "w_z_txt": lin(ks[5], GATED_HID, GATED_HID),
        "b_z": jax.random.normal(ks[6], (1, GATED_HID), jnp.float32) * 0.01,
        # fc_layer_gated: Linear(256, n_classes)
        "w_fc": lin(ks[7], GATED_HID, N_CLASSES),
        "b_fc": jax.random.normal(ks[8], (1, N_CLASSES), jnp.float32) * 0.01,
        # surrogate backbone params
        "tok_embed": jax.random.normal(ks[9], (VOCAB, TXT_FEAT), jnp.float32) * 0.02,
        "img_stem": jax.random.normal(ks[10], (3, IMG_FEAT), jnp.float32) * 0.1,
    }
    return params


def surrogate_backbones(input_ids, attention_mask, images, params):
    # TODO(synk): the frozen pretrained DistilBERT and EfficientNetV2-M
    # backbones have no clean Pallas equivalent here; replaced by deterministic
    # surrogate feature extractors producing the same feature shapes
    # ((B, 768) text CLS feature, (B, 1280) image feature).
    mask = attention_mask.astype(jnp.float32)
    emb = params["tok_embed"][input_ids]                        # (B, S, 768)
    txt_feat = jnp.tanh((emb * mask[..., None]).sum(axis=1)
                        / jnp.maximum(mask.sum(axis=1, keepdims=True), 1.0))
    pooled = images.mean(axis=(2, 3))                           # NCHW -> (B, 3)
    img_feat = jnp.tanh(pooled @ params["img_stem"])            # (B, 1280)
    return txt_feat.astype(jnp.float32), img_feat.astype(jnp.float32)


@jax.jit
def forward(input_ids, attention_mask, images, params):
    # Backbone surrogates + gated fusion head fused into a single dispatch.
    txt_feat, img_feat = surrogate_backbones(input_ids, attention_mask,
                                             images, params)
    return gated_forward(img_feat, txt_feat, params)


# ---------------------------------------------------------------------------
if __name__ == "__main__":
    key = jax.random.PRNGKey(0)
    k_ids, k_img, k_par = jax.random.split(key, 3)

    input_ids = jax.random.randint(k_ids, (BATCH, SEQ), 0, VOCAB, jnp.int32)
    attention_mask = jnp.ones((BATCH, SEQ), jnp.int32)
    images = jax.random.normal(k_img, (BATCH, 3, 16, 16), jnp.float32)  # NCHW

    params = init_params(k_par)

    out = forward(input_ids, attention_mask, images, params)
    out = jax.block_until_ready(out)
    assert out.shape == (BATCH, N_CLASSES)
    assert bool(jnp.all(jnp.isfinite(out)))
    print("KERNEL_OK")
</pallas_src>

<mosaic_0001>
module attributes {stable_mosaic.version = 11 : i64} {
  func.func @gated_fusion_kernel(%arg0: i32, %arg1: memref<16x1280xbf16, #tpu.memory_space<vmem>>, %arg2: memref<16x768xbf16, #tpu.memory_space<vmem>>, %arg3: memref<1280x256xbf16, #tpu.memory_space<vmem>>, %arg4: memref<1x256xf32, #tpu.memory_space<vmem>>, %arg5: memref<768x256xbf16, #tpu.memory_space<vmem>>, %arg6: memref<1x256xf32, #tpu.memory_space<vmem>>, %arg7: memref<256x256xbf16, #tpu.memory_space<vmem>>, %arg8: memref<256x256xbf16, #tpu.memory_space<vmem>>, %arg9: memref<1x256xf32, #tpu.memory_space<vmem>>, %arg10: memref<256x128xbf16, #tpu.memory_space<vmem>>, %arg11: memref<1x128xf32, #tpu.memory_space<vmem>>, %arg12: memref<16x128xf32, #tpu.memory_space<vmem>>) attributes {dimension_semantics = [#tpu.dimension_semantics<parallel>], iteration_bounds = array<i64: 1>, scalar_prefetch = 0 : i64, scratch_operands = 0 : i64, tpu.core_type = #tpu.core_type<tc>, window_params = [{transform_indices = @transform_0, window_bounds = array<i64: 16, 1280>}, {transform_indices = @transform_1, window_bounds = array<i64: 16, 768>}, {pipeline_mode = #tpu.pipeline_mode<synchronous>, transform_indices = @transform_2, window_bounds = array<i64: 1280, 256>}, {pipeline_mode = #tpu.pipeline_mode<synchronous>, transform_indices = @transform_3, window_bounds = array<i64: 1, 256>}, {pipeline_mode = #tpu.pipeline_mode<synchronous>, transform_indices = @transform_4, window_bounds = array<i64: 768, 256>}, {pipeline_mode = #tpu.pipeline_mode<synchronous>, transform_indices = @transform_5, window_bounds = array<i64: 1, 256>}, {pipeline_mode = #tpu.pipeline_mode<synchronous>, transform_indices = @transform_6, window_bounds = array<i64: 256, 256>}, {pipeline_mode = #tpu.pipeline_mode<synchronous>, transform_indices = @transform_7, window_bounds = array<i64: 256, 256>}, {pipeline_mode = #tpu.pipeline_mode<synchronous>, transform_indices = @transform_8, window_bounds = array<i64: 1, 256>}, {pipeline_mode = #tpu.pipeline_mode<synchronous>, transform_indices = @transform_9, window_bounds = array<i64: 256, 128>}, {pipeline_mode = #tpu.pipeline_mode<synchronous>, transform_indices = @transform_10, window_bounds = array<i64: 1, 128>}, {transform_indices = @transform_11, window_bounds = array<i64: 16, 128>}]} {
    %c0 = arith.constant 0 : index
    %c0_0 = arith.constant 0 : index
    %0 = vector.load %arg1[%c0, %c0_0] : memref<16x1280xbf16, #tpu.memory_space<vmem>>, vector<16x1280xbf16>
    %c0_1 = arith.constant 0 : index
    %c0_2 = arith.constant 0 : index
    %1 = vector.load %arg2[%c0_1, %c0_2] : memref<16x768xbf16, #tpu.memory_space<vmem>>, vector<16x768xbf16>
    %c0_3 = arith.constant 0 : index
    %c0_4 = arith.constant 0 : index
    %2 = vector.load %arg3[%c0_3, %c0_4] : memref<1280x256xbf16, #tpu.memory_space<vmem>>, vector<1280x256xbf16>
    %cst = arith.constant dense<0.000000e+00> : vector<16x256xf32>
    %3 = tpu.matmul %0, %2, %cst {dimension_numbers = #tpu.dot_dimension_numbers<[1], [0], [0], [1], [0, 0, 1, 1], [], []>} : vector<16x1280xbf16>, vector<1280x256xbf16>, vector<16x256xf32> -> vector<16x256xf32>
    %c0_5 = arith.constant 0 : index
    %c0_6 = arith.constant 0 : index
    %4 = vector.load %arg4[%c0_5, %c0_6] : memref<1x256xf32, #tpu.memory_space<vmem>>, vector<1x256xf32>
    %5 = vector.broadcast %4 : vector<1x256xf32> to vector<16x256xf32>
    %6 = arith.addf %3, %5 : vector<16x256xf32>
    %c0_7 = arith.constant 0 : index
    %c0_8 = arith.constant 0 : index
    %7 = vector.load %arg5[%c0_7, %c0_8] : memref<768x256xbf16, #tpu.memory_space<vmem>>, vector<768x256xbf16>
    %cst_9 = arith.constant dense<0.000000e+00> : vector<16x256xf32>
    %8 = tpu.matmul %1, %7, %cst_9 {dimension_numbers = #tpu.dot_dimension_numbers<[1], [0], [0], [1], [0, 0, 1, 1], [], []>} : vector<16x768xbf16>, vector<768x256xbf16>, vector<16x256xf32> -> vector<16x256xf32>
    %c0_10 = arith.constant 0 : index
    %c0_11 = arith.constant 0 : index
    %9 = vector.load %arg6[%c0_10, %c0_11] : memref<1x256xf32, #tpu.memory_space<vmem>>, vector<1x256xf32>
    %10 = vector.broadcast %9 : vector<1x256xf32> to vector<16x256xf32>
    %11 = arith.addf %8, %10 : vector<16x256xf32>
    %12 = math.tanh %6 : vector<16x256xf32>
    %13 = math.tanh %11 : vector<16x256xf32>
    %14 = arith.truncf %6 : vector<16x256xf32> to vector<16x256xbf16>
    %c0_12 = arith.constant 0 : index
    %c0_13 = arith.constant 0 : index
    %15 = vector.load %arg7[%c0_12, %c0_13] : memref<256x256xbf16, #tpu.memory_space<vmem>>, vector<256x256xbf16>
    %cst_14 = arith.constant dense<0.000000e+00> : vector<16x256xf32>
    %16 = tpu.matmul %14, %15, %cst_14 {dimension_numbers = #tpu.dot_dimension_numbers<[1], [0], [0], [1], [0, 0, 1, 1], [], []>} : vector<16x256xbf16>, vector<256x256xbf16>, vector<16x256xf32> -> vector<16x256xf32>
    %17 = arith.truncf %11 : vector<16x256xf32> to vector<16x256xbf16>
    %c0_15 = arith.constant 0 : index
    %c0_16 = arith.constant 0 : index
    %18 = vector.load %arg8[%c0_15, %c0_16] : memref<256x256xbf16, #tpu.memory_space<vmem>>, vector<256x256xbf16>
    %cst_17 = arith.constant dense<0.000000e+00> : vector<16x256xf32>
    %19 = tpu.matmul %17, %18, %cst_17 {dimension_numbers = #tpu.dot_dimension_numbers<[1], [0], [0], [1], [0, 0, 1, 1], [], []>} : vector<16x256xbf16>, vector<256x256xbf16>, vector<16x256xf32> -> vector<16x256xf32>
    %20 = arith.addf %16, %19 : vector<16x256xf32>
    %c0_18 = arith.constant 0 : index
    %c0_19 = arith.constant 0 : index
    %21 = vector.load %arg9[%c0_18, %c0_19] : memref<1x256xf32, #tpu.memory_space<vmem>>, vector<1x256xf32>
    %22 = vector.broadcast %21 : vector<1x256xf32> to vector<16x256xf32>
    %23 = arith.addf %20, %22 : vector<16x256xf32>
    %cst_20 = arith.constant dense<0xFF800000> : vector<16xf32>
    %24 = vector.multi_reduction <maximumf>, %23, %cst_20 [1] : vector<16x256xf32> to vector<16xf32>
    %25 = vector.shape_cast %24 : vector<16xf32> to vector<16x1xf32>
    %26 = vector.broadcast %25 : vector<16x1xf32> to vector<16x256xf32>
    %27 = arith.subf %23, %26 : vector<16x256xf32>
    %28 = math.exp %27 : vector<16x256xf32>
    %cst_21 = arith.constant dense<0.000000e+00> : vector<16xf32>
    %29 = vector.multi_reduction <add>, %28, %cst_21 [1] : vector<16x256xf32> to vector<16xf32>
    %30 = vector.shape_cast %29 : vector<16xf32> to vector<16x1xf32>
    %31 = tpu.reciprocal %30 {approx = true} : vector<16x1xf32> -> vector<16x1xf32>
    %32 = vector.broadcast %31 : vector<16x1xf32> to vector<16x256xf32>
    %33 = arith.mulf %28, %32 : vector<16x256xf32>
    %34 = arith.subf %12, %13 : vector<16x256xf32>
    %35 = arith.mulf %33, %34 : vector<16x256xf32>
    %36 = arith.addf %13, %35 : vector<16x256xf32>
    %37 = arith.truncf %36 : vector<16x256xf32> to vector<16x256xbf16>
    %c0_22 = arith.constant 0 : index
    %c0_23 = arith.constant 0 : index
    %38 = vector.load %arg10[%c0_22, %c0_23] : memref<256x128xbf16, #tpu.memory_space<vmem>>, vector<256x128xbf16>
    %cst_24 = arith.constant dense<0.000000e+00> : vector<16x128xf32>
    %39 = tpu.matmul %37, %38, %cst_24 {dimension_numbers = #tpu.dot_dimension_numbers<[1], [0], [0], [1], [0, 0, 1, 1], [], []>} : vector<16x256xbf16>, vector<256x128xbf16>, vector<16x128xf32> -> vector<16x128xf32>
    %c0_25 = arith.constant 0 : index
    %c0_26 = arith.constant 0 : index
    %40 = vector.load %arg11[%c0_25, %c0_26] : memref<1x128xf32, #tpu.memory_space<vmem>>, vector<1x128xf32>
    %41 = vector.broadcast %40 : vector<1x128xf32> to vector<16x128xf32>
    %42 = arith.addf %39, %41 : vector<16x128xf32>
    %c0_27 = arith.constant 0 : index
    %c0_28 = arith.constant 0 : index
    %43 = vector.load %arg12[%c0_27, %c0_28] : memref<16x128xf32, #tpu.memory_space<vmem>>, vector<16x128xf32>
    tpu.vector_store %arg12[%c0_27, %c0_28], %42 {strides = array<i32>} : memref<16x128xf32, #tpu.memory_space<vmem>>, vector<16x128xf32>,
    return
  }
  func.func @transform_0(%arg0: i32) -> (i32, i32) {
    %c0_i32 = arith.constant 0 : i32
    %c0_i32_0 = arith.constant 0 : i32
    return %arg0, %c0_i32 : i32, i32
  }
  func.func @transform_1(%arg0: i32) -> (i32, i32) {
    %c0_i32 = arith.constant 0 : i32
    %c0_i32_0 = arith.constant 0 : i32
    return %arg0, %c0_i32 : i32, i32
  }
  func.func @transform_2(%arg0: i32) -> (i32, i32) {
    %c0_i32 = arith.constant 0 : i32
    %c0_i32_0 = arith.constant 0 : i32
    %c0_i32_1 = arith.constant 0 : i32
    return %c0_i32, %c0_i32_0 : i32, i32
  }
  func.func @transform_3(%arg0: i32) -> (i32, i32) {
    %c0_i32 = arith.constant 0 : i32
    %c0_i32_0 = arith.constant 0 : i32
    %c0_i32_1 = arith.constant 0 : i32
    return %c0_i32, %c0_i32_0 : i32, i32
  }
  func.func @transform_4(%arg0: i32) -> (i32, i32) {
    %c0_i32 = arith.constant 0 : i32
    %c0_i32_0 = arith.constant 0 : i32
    %c0_i32_1 = arith.constant 0 : i32
    return %c0_i32, %c0_i32_0 : i32, i32
  }
  func.func @transform_5(%arg0: i32) -> (i32, i32) {
    %c0_i32 = arith.constant 0 : i32
    %c0_i32_0 = arith.constant 0 : i32
    %c0_i32_1 = arith.constant 0 : i32
    return %c0_i32, %c0_i32_0 : i32, i32
  }
  func.func @transform_6(%arg0: i32) -> (i32, i32) {
    %c0_i32 = arith.constant 0 : i32
    %c0_i32_0 = arith.constant 0 : i32
    %c0_i32_1 = arith.constant 0 : i32
    return %c0_i32, %c0_i32_0 : i32, i32
  }
  func.func @transform_7(%arg0: i32) -> (i32, i32) {
    %c0_i32 = arith.constant 0 : i32
    %c0_i32_0 = arith.constant 0 : i32
    %c0_i32_1 = arith.constant 0 : i32
    return %c0_i32, %c0_i32_0 : i32, i32
  }
  func.func @transform_8(%arg0: i32) -> (i32, i32) {
    %c0_i32 = arith.constant 0 : i32
    %c0_i32_0 = arith.constant 0 : i32
    %c0_i32_1 = arith.constant 0 : i32
    return %c0_i32, %c0_i32_0 : i32, i32
  }
  func.func @transform_9(%arg0: i32) -> (i32, i32) {
    %c0_i32 = arith.constant 0 : i32
    %c0_i32_0 = arith.constant 0 : i32
    %c0_i32_1 = arith.constant 0 : i32
    return %c0_i32, %c0_i32_0 : i32, i32
  }
  func.func @transform_10(%arg0: i32) -> (i32, i32) {
    %c0_i32 = arith.constant 0 : i32
    %c0_i32_0 = arith.constant 0 : i32
    %c0_i32_1 = arith.constant 0 : i32
    return %c0_i32, %c0_i32_0 : i32, i32
  }
  func.func @transform_11(%arg0: i32) -> (i32, i32) {
    %c0_i32 = arith.constant 0 : i32
    %c0_i32_0 = arith.constant 0 : i32
    return %arg0, %c0_i32 : i32, i32
  }
}

</mosaic_0001>

<bundles_post_ra>
// kernel: forward.1
= control target key start
LH: loop header
LB: loop body
LE: loop exit
PB: predicated region body
PF: predicated region fallthrough
CT: control target
= control target key end

     0   :  { %s6941_s2 = inlined_call_operand.vmem [shape: bf16[1280,256], index: 2, kind: input, shape index: {}]   ;;  %s6942_s0 = inlined_call_operand.vmem [shape: bf16[16,1280], index: 0, kind: input, shape index: {}]   ;;  %s6943_s4 = inlined_call_operand.vmem [shape: bf16[768,256], index: 4, kind: input, shape index: {}]   ;;  %s6944_s3 = inlined_call_operand.vmem [shape: f32[1,256], index: 3, kind: input, shape index: {}]   ;;  %s6945_s1 = inlined_call_operand.vmem [shape: bf16[16,768], index: 1, kind: input, shape index: {}]   ;;  %s6946_s7 = inlined_call_operand.vmem [shape: bf16[256,256], index: 7, kind: input, shape index: {}]   ;;  %s6947_s6 = inlined_call_operand.vmem [shape: bf16[256,256], index: 6, kind: input, shape index: {}]   ;;  %s6948_s5 = inlined_call_operand.vmem [shape: f32[1,256], index: 5, kind: input, shape index: {}]   ;;  %s6949_s8 = inlined_call_operand.vmem [shape: f32[1,256], index: 8, kind: input, shape index: {}]   ;;  %s6950_s9 = inlined_call_operand.vmem [shape: bf16[256,128], index: 9, kind: input, shape index: {}]   ;;  %s6951_s10 = inlined_call_operand.vmem [shape: f32[1,128], index: 10, kind: input, shape index: {}]   ;;  %s6952_s11 = inlined_call_operand.vmem [shape: f32[16,128], index: 11, kind: output, shape index: {}]  }
   0x1   :  { %v2956_v0 = vld [vmem:[%s6941_s2 + $0x70] sm:$0xf]  ;;  %v4297_v1 = vld [vmem:[%s6941_s2 + $0x74] sm:$0xf0]  ;;  %v2948_v11 = vld [vmem:[%s6941_s2 + $0x60] sm:$0xf] }
   0x2   :  { %v3020_v2 = vld [vmem:[%s6941_s2 + $0xf0] sm:$0xf]  ;;  %v2957_v3 = vor.u32 %v4297_v1, %v2956_v0  ;;  %v4313_v4 = vld [vmem:[%s6941_s2 + $0xf4] sm:$0xf0]  ;;  %v4295_v13 = vld [vmem:[%s6941_s2 + $0x64] sm:$0xf0] }
   0x3   :  { %v3084_v5 = vld [vmem:[%s6941_s2 + $0x170] sm:$0xf]  ;;  %v4329_v6 = vld [vmem:[%s6941_s2 + $0x174] sm:$0xf0]  ;;  %v3021_v7 = vor.u32 %v4313_v4, %v3020_v2  ;;  %v3012_v14 = vld [vmem:[%s6941_s2 + $0xe0] sm:$0xf]  ;;  %v2949_v16 = vor.u32 %v4295_v13, %v2948_v11 }
   0x4   :  { %v3085_v8 = vor.u32 %v4329_v6, %v3084_v5  ;;  %v3148_v9 = vld [vmem:[%s6941_s2 + $0x1f0] sm:$0xf]  ;;  %v4345_v10 = vld [vmem:[%s6941_s2 + $0x1f4] sm:$0xf0]  ;;  %1070 = vmatpush.bf16.msra.mxu0 %v2957_v3  ;;  %v4311_v15 = vld [vmem:[%s6941_s2 + $0xe4] sm:$0xf0] }
   0x5   :  { %v3149_v12 = vor.u32 %v4345_v10, %v3148_v9  ;;  %1084 = vmatpush.bf16.msra.mxu1 %v3021_v7  ;;  %v3013_v17 = vor.u32 %v4311_v15, %v3012_v14  ;;  %v3076_v18 = vld [vmem:[%s6941_s2 + $0x160] sm:$0xf]  ;;  %v4327_v19 = vld [vmem:[%s6941_s2 + $0x164] sm:$0xf0]  ;;  %v2940_v23 = vld [vmem:[%s6941_s2 + $0x50] sm:$0xf] }
   0x6   :  { %1098 = vmatpush.bf16.msra.mxu2 %v3085_v8  ;;  %v3140_v20 = vld [vmem:[%s6941_s2 + $0x1e0] sm:$0xf]  ;;  %v3077_v21 = vor.u32 %v4327_v19, %v3076_v18  ;;  %v4343_v22 = vld [vmem:[%s6941_s2 + $0x1e4] sm:$0xf0]  ;;  %v4293_v24 = vld [vmem:[%s6941_s2 + $0x54] sm:$0xf0] }
   0x7   :  { %1112 = vmatpush.bf16.msra.mxu3 %v3149_v12  ;;  %v3141_v25 = vor.u32 %v4343_v22, %v3140_v20  ;;  %v3004_v26 = vld [vmem:[%s6941_s2 + $0xd0] sm:$0xf]  ;;  %v4309_v27 = vld [vmem:[%s6941_s2 + $0xd4] sm:$0xf0]  ;;  %v2941_v29 = vor.u32 %v4293_v24, %v2940_v23  ;;  %v2932_v35 = vld [vmem:[%s6941_s2 + $0x40] sm:$0xf] }
   0x8   :  { %v3068_v28 = vld [vmem:[%s6941_s2 + $0x150] sm:$0xf]  ;;  %1071 = vmatpush.bf16.msra.mxu0 %v2949_v16  ;;  %v4325_v30 = vld [vmem:[%s6941_s2 + $0x154] sm:$0xf0]  ;;  %v3005_v33 = vor.u32 %v4309_v27, %v3004_v26  ;;  %v4291_v36 = vld [vmem:[%s6941_s2 + $0x44] sm:$0xf0] }
   0x9   :  { %v3132_v31 = vld [vmem:[%s6941_s2 + $0x1d0] sm:$0xf]  ;;  %v4341_v32 = vld [vmem:[%s6941_s2 + $0x1d4] sm:$0xf0]  ;;  %1085 = vmatpush.bf16.msra.mxu1 %v3013_v17  ;;  %v3069_v34 = vor.u32 %v4325_v30, %v3068_v28  ;;  %v2996_v37 = vld [vmem:[%s6941_s2 + $0xc0] sm:$0xf]  ;;  %v2933_v44 = vor.u32 %v4291_v36, %v2932_v35 }
   0xa   :  { %1099 = vmatpush.bf16.msra.mxu2 %v3077_v21  ;;  %v3133_v38 = vor.u32 %v4341_v32, %v3132_v31  ;;  %v4307_v39 = vld [vmem:[%s6941_s2 + $0xc4] sm:$0xf0]  ;;  %v3060_v40 = vld [vmem:[%s6941_s2 + $0x140] sm:$0xf]  ;;  %v2924_v47 = vld [vmem:[%s6941_s2 + $0x30] sm:$0xf] }
   0xb   :  { %1113 = vmatpush.bf16.msra.mxu3 %v3141_v25  ;;  %v4323_v41 = vld [vmem:[%s6941_s2 + $0x144] sm:$0xf0]  ;;  %v3124_v42 = vld [vmem:[%s6941_s2 + $0x1c0] sm:$0xf]  ;;  %v2997_v45 = vor.u32 %v4307_v39, %v2996_v37  ;;  %v4289_v48 = vld [vmem:[%s6941_s2 + $0x34] sm:$0xf0] }
   0xc   :  { %v4339_v43 = vld [vmem:[%s6941_s2 + $0x1c4] sm:$0xf0]  ;;  %1072 = vmatpush.bf16.msra.mxu0 %v2941_v29  ;;  %v3061_v46 = vor.u32 %v4323_v41, %v3060_v40  ;;  %v2988_v49 = vld [vmem:[%s6941_s2 + $0xb0] sm:$0xf]  ;;  %v4305_v51 = vld [vmem:[%s6941_s2 + $0xb4] sm:$0xf0]  ;;  %v2925_v56 = vor.u32 %v4289_v48, %v2924_v47 }
   0xd   :  { %1086 = vmatpush.bf16.msra.mxu1 %v3005_v33  ;;  %v3125_v50 = vor.u32 %v4339_v43, %v3124_v42  ;;  %v3052_v52 = vld [vmem:[%s6941_s2 + $0x130] sm:$0xf]  ;;  %v4321_v53 = vld [vmem:[%s6941_s2 + $0x134] sm:$0xf0]  ;;  %v2989_v57 = vor.u32 %v4305_v51, %v2988_v49  ;;  %v2916_v59 = vld [vmem:[%s6941_s2 + $0x20] sm:$0xf] }
   0xe   :  { %1100 = vmatpush.bf16.msra.mxu2 %v3069_v34  ;;  %v3116_v54 = vld [vmem:[%s6941_s2 + $0x1b0] sm:$0xf]  ;;  %v4337_v55 = vld [vmem:[%s6941_s2 + $0x1b4] sm:$0xf0]  ;;  %v3053_v58 = vor.u32 %v4321_v53, %v3052_v52  ;;  %v4287_v60 = vld [vmem:[%s6941_s2 + $0x24] sm:$0xf0] }
   0xf   :  { %1114 = vmatpush.bf16.msra.mxu3 %v3133_v38  ;;  %v2980_v61 = vld [vmem:[%s6941_s2 + $0xa0] sm:$0xf]  ;;  %v3117_v62 = vor.u32 %v4337_v55, %v3116_v54  ;;  %v4303_v63 = vld [vmem:[%s6941_s2 + $0xa4] sm:$0xf0]  ;;  %v2917_v4 = vor.u32 %v4287_v60, %v2916_v59  ;;  %v2908_v7 = vld [vmem:[%s6941_s2 + $0x10] sm:$0xf] }
  0x10   :  { %1073 = vmatpush.bf16.msra.mxu0 %v2933_v44  ;;  %v3044_v0 = vld [vmem:[%s6941_s2 + $0x120] sm:$0xf]  ;;  %v4319_v1 = vld [vmem:[%s6941_s2 + $0x124] sm:$0xf0]  ;;  %v2981_v5 = vor.u32 %v4303_v63, %v2980_v61  ;;  %v4285_v8 = vld [vmem:[%s6941_s2 + $0x14] sm:$0xf0] }
  0x11   :  { %1087 = vmatpush.bf16.msra.mxu1 %v2997_v45  ;;  %v3108_v2 = vld [vmem:[%s6941_s2 + $0x1a0] sm:$0xf]  ;;  %v4335_v3 = vld [vmem:[%s6941_s2 + $0x1a4] sm:$0xf0]  ;;  %v3045_v6 = vor.u32 %v4319_v1, %v3044_v0  ;;  %v2972_v9 = vld [vmem:[%s6941_s2 + $0x90] sm:$0xf]  ;;  %v2909_v16 = vor.u32 %v4285_v8, %v2908_v7 }
  0x12   :  { %1101 = vmatpush.bf16.msra.mxu2 %v3061_v46  ;;  %v3109_v10 = vor.u32 %v4335_v3, %v3108_v2  ;;  %v4301_v11 = vld [vmem:[%s6941_s2 + $0x94] sm:$0xf0]  ;;  %v3036_v12 = vld [vmem:[%s6941_s2 + $0x110] sm:$0xf]  ;;  %v2900_v17 = vld [vmem:[%s6941_s2] sm:$0xf] }
  0x13   :  { %1115 = vmatpush.bf16.msra.mxu3 %v3125_v50  ;;  %v4317_v13 = vld [vmem:[%s6941_s2 + $0x114] sm:$0xf0]  ;;  %v3100_v14 = vld [vmem:[%s6941_s2 + $0x190] sm:$0xf]  ;;  %v4283_v18 = vld [vmem:[%s6941_s2 + $0x4] sm:$0xf0]  ;;  %v2973_v19 = vor.u32 %v4301_v11, %v2972_v9 }
  0x14   :  { %1074 = vmatpush.bf16.msra.mxu0 %v2925_v56  ;;  %v4333_v15 = vld [vmem:[%s6941_s2 + $0x194] sm:$0xf0]  ;;  %v3037_v20 = vor.u32 %v4317_v13, %v3036_v12  ;;  %v2964_v21 = vld [vmem:[%s6941_s2 + $0x80] sm:$0xf]  ;;  %v4299_v22 = vld [vmem:[%s6941_s2 + $0x84] sm:$0xf0]  ;;  %v2901_v31 = vor.u32 %v4283_v18, %v2900_v17 }
  0x15   :  { %1088 = vmatpush.bf16.msra.mxu1 %v2989_v57  ;;  %v3028_v23 = vld [vmem:[%s6941_s2 + $0x100] sm:$0xf]  ;;  %v3101_v24 = vor.u32 %v4333_v15, %v3100_v14  ;;  %v4315_v25 = vld [vmem:[%s6941_s2 + $0x104] sm:$0xf0]  ;;  %v3212_v28 = vld [vmem:[%s6941_s2 + $0x270] sm:$0xf]  ;;  %v2965_v35 = vor.u32 %v4299_v22, %v2964_v21 }
  0x16   :  { %1102 = vmatpush.bf16.msra.mxu2 %v3053_v58  ;;  %v3092_v26 = vld [vmem:[%s6941_s2 + $0x180] sm:$0xf]  ;;  %v4331_v27 = vld [vmem:[%s6941_s2 + $0x184] sm:$0xf0]  ;;  %v4361_v29 = vld [vmem:[%s6941_s2 + $0x274] sm:$0xf0]  ;;  %v3029_v36 = vor.u32 %v4315_v25, %v3028_v23 }
  0x17   :  { %1116 = vmatpush.bf16.msra.mxu3 %v3117_v62  ;;  %v3276_v30 = vld [vmem:[%s6941_s2 + $0x2f0] sm:$0xf]  ;;  %v4377_v32 = vld [vmem:[%s6941_s2 + $0x2f4] sm:$0xf0]  ;;  %v3093_v39 = vor.u32 %v4331_v27, %v3092_v26  ;;  %v3213_v40 = vor.u32 %v4361_v29, %v3212_v28  ;;  %v3204_v41 = vld [vmem:[%s6941_s2 + $0x260] sm:$0xf] }
  0x18   :  { %1075 = vmatpush.bf16.msra.mxu0 %v2917_v4  ;;  %v3340_v33 = vld [vmem:[%s6941_s2 + $0x370] sm:$0xf]  ;;  %v4393_v34 = vld [vmem:[%s6941_s2 + $0x374] sm:$0xf0]  ;;  %v4359_v42 = vld [vmem:[%s6941_s2 + $0x264] sm:$0xf0]  ;;  %v3277_v43 = vor.u32 %v4377_v32, %v3276_v30 }
  0x19   :  { %1089 = vmatpush.bf16.msra.mxu1 %v2981_v5  ;;  %v3404_v37 = vld [vmem:[%s6941_s2 + $0x3f0] sm:$0xf]  ;;  %v4409_v38 = vld [vmem:[%s6941_s2 + $0x3f4] sm:$0xf0]  ;;  %v3341_v44 = vor.u32 %v4393_v34, %v3340_v33  ;;  %v3268_v45 = vld [vmem:[%s6941_s2 + $0x2e0] sm:$0xf]  ;;  %v3205_v55 = vor.u32 %v4359_v42, %v3204_v41 }
  0x1a   :  { %1103 = vmatpush.bf16.msra.mxu2 %v3045_v6  ;;  %v4375_v46 = vld [vmem:[%s6941_s2 + $0x2e4] sm:$0xf0]  ;;  %v3332_v47 = vld [vmem:[%s6941_s2 + $0x360] sm:$0xf]  ;;  %v3405_v48 = vor.u32 %v4409_v38, %v3404_v37  ;;  %v3196_v56 = vld [vmem:[%s6941_s2 + $0x250] sm:$0xf] }
  0x1b   :  { %1117 = vmatpush.bf16.msra.mxu3 %v3109_v10  ;;  %v4391_v49 = vld [vmem:[%s6941_s2 + $0x364] sm:$0xf0]  ;;  %v3396_v50 = vld [vmem:[%s6941_s2 + $0x3e0] sm:$0xf]  ;;  %v4357_v57 = vld [vmem:[%s6941_s2 + $0x254] sm:$0xf0]  ;;  %v3269_v60 = vor.u32 %v4375_v46, %v3268_v45 }
  0x1c   :  { %1076 = vmatpush.bf16.msra.mxu0 %v2909_v16  ;;  %v4407_v51 = vld [vmem:[%s6941_s2 + $0x3e4] sm:$0xf0]  ;;  %v2860_v52 = vld [vmem:[%s6942_s0] sm:$0xf]  ;;  %v4272_v59 = vld [vmem:[%s6942_s0 + $0x2c] sm:$0xf0]  ;;  %v3333_v61 = vor.u32 %v4391_v49, %v3332_v47  ;;  %v3197_v9 = vor.u32 %v4357_v57, %v3196_v56 }
  0x1d   :  { %1090 = vmatpush.bf16.msra.mxu1 %v2973_v19  ;;  %v4271_v53 = vld [vmem:[%s6942_s0 + $0x24] sm:$0xf0]  ;;  %v3260_v62 = vld [vmem:[%s6941_s2 + $0x2d0] sm:$0xf]  ;;  %v4373_v63 = vld [vmem:[%s6941_s2 + $0x2d4] sm:$0xf0]  ;;  %v3397_v2 = vor.u32 %v4407_v51, %v3396_v50 }
  0x1e   :  { %1104 = vmatpush.bf16.msra.mxu2 %v3037_v20  ;;  %v2868_v54 = vld [vmem:[%s6942_s0 + $0x8] sm:$0xf]  ;;  %v4962_v58 = vor.u32 %v4271_v53, %v2860_v52  ;;  %v3324_v0 = vld [vmem:[%s6941_s2 + $0x350] sm:$0xf]  ;;  %v4389_v3 = vld [vmem:[%s6941_s2 + $0x354] sm:$0xf0]  ;;  %v3261_v12 = vor.u32 %v4373_v63, %v3260_v62 }
  0x1f   :  { %1118 = vmatpush.bf16.msra.mxu3 %v3101_v24  ;;  %v4976_v1 = vor.u32 %v4272_v59, %v2868_v54  ;;  %v3388_v4 = vld [vmem:[%s6941_s2 + $0x3d0] sm:$0xf]  ;;  %v4405_v5 = vld [vmem:[%s6941_s2 + $0x3d4] sm:$0xf0]  ;;  %v4266_v6 = vld [vmem:[%s6942_s0 + $0x4] sm:$0xf]  ;;  %v3325_v13 = vor.u32 %v4389_v3, %v3324_v0 }
  0x20   :  { %1077 = vmatpush.bf16.msra.mxu0 %v2901_v31  ;;  %v2862_v7 = vld [vmem:[%s6942_s0 + $0x28] sm:$0xf0]  ;;  %v2870_v11 = vld [vmem:[%s6942_s0 + $0x30] sm:$0xf0]  ;;  %v3188_v14 = vld [vmem:[%s6941_s2 + $0x240] sm:$0xf]  ;;  %v3389_v18 = vor.u32 %v4405_v5, %v3388_v4 }
  0x21   :  { %1091 = vmatpush.bf16.msra.mxu1 %v2965_v35  ;;  %v4267_v8 = vld [vmem:[%s6942_s0 + $0xc] sm:$0xf]  ;;  %v4998_v10 = vor.u32 %v4266_v6, %v2862_v7  ;;  %v4355_v15 = vld [vmem:[%s6941_s2 + $0x244] sm:$0xf0]  ;;  %v3252_v16 = vld [vmem:[%s6941_s2 + $0x2c0] sm:$0xf] }
  0x22   :  { %1105 = vmatpush.bf16.msra.mxu2 %v3029_v36  ;;  %v5012_v17 = vor.u32 %v4267_v8, %v2870_v11  ;;  %v4371_v19 = vld [vmem:[%s6941_s2 + $0x2c4] sm:$0xf0]  ;;  %v3316_v20 = vld [vmem:[%s6941_s2 + $0x340] sm:$0xf]  ;;  %v3189_v24 = vor.u32 %v4355_v15, %v3188_v14  ;;  %v3180_v27 = vld [vmem:[%s6941_s2 + $0x230] sm:$0xf] }
  0x23   :  { %1119 = vmatpush.bf16.msra.mxu3 %v3093_v39  ;;  %1078 = vmatmul.bf16.vlgmr.msra.gmra.mxu0 %v4962_v58  ;;  %v4387_v21 = vld [vmem:[%s6941_s2 + $0x344] sm:$0xf0]  ;;  %v3380_v22 = vld [vmem:[%s6941_s2 + $0x3c0] sm:$0xf]  ;;  %v3253_v25 = vor.u32 %v4371_v19, %v3252_v16  ;;  %v4353_v28 = vld [vmem:[%s6941_s2 + $0x234] sm:$0xf0] }
  0x24   :  { %1126 = vmatpush.bf16.msrb.mxu0 %v3213_v40  ;;  %1092 = vmatmul.bf16.vlgmr.msra.gmra.mxu1 %v4998_v10  ;;  %v4403_v23 = vld [vmem:[%s6941_s2 + $0x3c4] sm:$0xf0]  ;;  %v3317_v26 = vor.u32 %v4387_v21, %v3316_v20  ;;  %v3244_v29 = vld [vmem:[%s6941_s2 + $0x2b0] sm:$0xf]  ;;  %v4369_v31 = vld [vmem:[%s6941_s2 + $0x2b4] sm:$0xf0]  ;;  %v3181_v36 = vor.u32 %v4353_v28, %v3180_v27 }
  0x25   :  { %1140 = vmatpush.bf16.msrb.mxu1 %v3277_v43  ;;  %1106 = vmatmul.bf16.vlgmr.msra.gmra.mxu2 %v4976_v1  ;;  %v3381_v30 = vor.u32 %v4403_v23, %v3380_v22  ;;  %v3308_v32 = vld [vmem:[%s6941_s2 + $0x330] sm:$0xf]  ;;  %v4385_v33 = vld [vmem:[%s6941_s2 + $0x334] sm:$0xf0]  ;;  %v3245_v37 = vor.u32 %v4369_v31, %v3244_v29  ;;  %v3172_v39 = vld [vmem:[%s6941_s2 + $0x220] sm:$0xf] }
  0x26   :  { %1154 = vmatpush.bf16.msrb.mxu2 %v3341_v44  ;;  %1120 = vmatmul.bf16.vlgmr.msra.gmra.mxu3 %v5012_v17  ;;  %v3372_v34 = vld [vmem:[%s6941_s2 + $0x3b0] sm:$0xf]  ;;  %v4401_v35 = vld [vmem:[%s6941_s2 + $0x3b4] sm:$0xf0]  ;;  %v3309_v38 = vor.u32 %v4385_v33, %v3308_v32  ;;  %v4351_v40 = vld [vmem:[%s6941_s2 + $0x224] sm:$0xf0] }
  0x27   :  { %1168 = vmatpush.bf16.msrb.mxu3 %v3405_v48  ;;  %v3236_v41 = vld [vmem:[%s6941_s2 + $0x2a0] sm:$0xf]  ;;  %v3373_v42 = vor.u32 %v4401_v35, %v3372_v34  ;;  %v4367_v43 = vld [vmem:[%s6941_s2 + $0x2a4] sm:$0xf0]  ;;  %v3173_v48 = vor.u32 %v4351_v40, %v3172_v39  ;;  %v3164_v49 = vld [vmem:[%s6941_s2 + $0x210] sm:$0xf] }
  0x28   :  { %1127 = vmatpush.bf16.msrb.mxu0 %v3205_v55  ;;  %v3300_v44 = vld [vmem:[%s6941_s2 + $0x320] sm:$0xf]  ;;  %v4383_v45 = vld [vmem:[%s6941_s2 + $0x324] sm:$0xf0]  ;;  %v3237_v50 = vor.u32 %v4367_v43, %v3236_v41  ;;  %v4349_v52 = vld [vmem:[%s6941_s2 + $0x214] sm:$0xf0] }
  0x29   :  { %1141 = vmatpush.bf16.msrb.mxu1 %v3269_v60  ;;  %v3364_v46 = vld [vmem:[%s6941_s2 + $0x3a0] sm:$0xf]  ;;  %v4399_v47 = vld [vmem:[%s6941_s2 + $0x3a4] sm:$0xf0]  ;;  %v3301_v51 = vor.u32 %v4383_v45, %v3300_v44  ;;  %v3228_v53 = vld [vmem:[%s6941_s2 + $0x290] sm:$0xf]  ;;  %v3165_v63 = vor.u32 %v4349_v52, %v3164_v49 }
  0x2a   :  { %1155 = vmatpush.bf16.msrb.mxu2 %v3333_v61  ;;  %v4365_v54 = vld [vmem:[%s6941_s2 + $0x294] sm:$0xf0]  ;;  %v3365_v55 = vor.u32 %v4399_v47, %v3364_v46  ;;  %v3292_v56 = vld [vmem:[%s6941_s2 + $0x310] sm:$0xf]  ;;  %v3156_v61 = vld [vmem:[%s6941_s2 + $0x200] sm:$0xf] }
  0x2b   :  { %1169 = vmatpush.bf16.msrb.mxu3 %v3397_v2  ;;  %v4381_v57 = vld [vmem:[%s6941_s2 + $0x314] sm:$0xf0]  ;;  %v3356_v59 = vld [vmem:[%s6941_s2 + $0x390] sm:$0xf]  ;;  %v4347_v62 = vld [vmem:[%s6941_s2 + $0x204] sm:$0xf0]  ;;  %v3229_v5 = vor.u32 %v4365_v54, %v3228_v53 }
  0x2c   :  { %1128 = vmatpush.bf16.msrb.mxu0 %v3197_v9  ;;  %v4397_v60 = vld [vmem:[%s6941_s2 + $0x394] sm:$0xf0]  ;;  %v3220_v0 = vld [vmem:[%s6941_s2 + $0x280] sm:$0xf]  ;;  %v4363_v2 = vld [vmem:[%s6941_s2 + $0x284] sm:$0xf0]  ;;  %v3293_v6 = vor.u32 %v4381_v57, %v3292_v56  ;;  %v3157_v19 = vor.u32 %v4347_v62, %v3156_v61 }
  0x2d   :  { %1142 = vmatpush.bf16.msrb.mxu1 %v3261_v12  ;;  %v3284_v3 = vld [vmem:[%s6941_s2 + $0x300] sm:$0xf]  ;;  %v4379_v4 = vld [vmem:[%s6941_s2 + $0x304] sm:$0xf0]  ;;  %v3468_v9 = vld [vmem:[%s6941_s2 + $0x470] sm:$0xf]  ;;  %v3357_v11 = vor.u32 %v4397_v60, %v3356_v59  ;;  %v3221_v23 = vor.u32 %v4363_v2, %v3220_v0 }
  0x2e   :  { %1156 = vmatpush.bf16.msrb.mxu2 %v3325_v13  ;;  %v3348_v7 = vld [vmem:[%s6941_s2 + $0x380] sm:$0xf]  ;;  %v4395_v8 = vld [vmem:[%s6941_s2 + $0x384] sm:$0xf0]  ;;  %v4425_v12 = vld [vmem:[%s6941_s2 + $0x474] sm:$0xf0] }
  0x2f   :  { %1170 = vmatpush.bf16.msrb.mxu3 %v3389_v18  ;;  %v3532_v13 = vld [vmem:[%s6941_s2 + $0x4f0] sm:$0xf]  ;;  %v4441_v14 = vld [vmem:[%s6941_s2 + $0x4f4] sm:$0xf0]  ;;  %v4296_v15 = vld [vmem:[%s6941_s2 + $0x74] sm:$0xf]  ;;  %v3349_v28 = vor.u32 %v4395_v8, %v3348_v7  ;;  %v3469_v29 = vor.u32 %v4425_v12, %v3468_v9 }
  0x30   :  { %1129 = vmatpush.bf16.msrb.mxu0 %v3189_v24  ;;  %v2958_v16 = vld [vmem:[%s6941_s2 + $0x78] sm:$0xf0]  ;;  %v4312_v18 = vld [vmem:[%s6941_s2 + $0xf4] sm:$0xf]  ;;  %v2876_v21 = vld [vmem:[%s6942_s0 + $0x10] sm:$0xf]  ;;  %v3285_v24 = vor.u32 %v4379_v4, %v3284_v3  ;;  %v3533_v33 = vor.u32 %v4441_v14, %v3532_v13 }
  0x31   :  { %1143 = vmatpush.bf16.msrb.mxu1 %v3253_v25  ;;  %v3022_v20 = vld [vmem:[%s6941_s2 + $0xf8] sm:$0xf0]  ;;  %v4273_v22 = vld [vmem:[%s6942_s0 + $0x34] sm:$0xf0]  ;;  %v4268_v27 = vld [vmem:[%s6942_s0 + $0x14] sm:$0xf]  ;;  %v2961_v34 = vor.u32 %v4296_v15, %v2958_v16 }
  0x32   :  { %1157 = vmatpush.bf16.msrb.mxu2 %v3317_v26  ;;  %v2884_v25 = vld [vmem:[%s6942_s0 + $0x18] sm:$0xf]  ;;  %v4274_v26 = vld [vmem:[%s6942_s0 + $0x3c] sm:$0xf0]  ;;  %v4269_v31 = vld [vmem:[%s6942_s0 + $0x1c] sm:$0xf]  ;;  %v5184_v39 = vor.u32 %v4273_v22, %v2876_v21 }
  0x33   :  { %1171 = vmatpush.bf16.msrb.mxu3 %v3381_v30  ;;  %v2878_v30 = vld [vmem:[%s6942_s0 + $0x38] sm:$0xf0]  ;;  %v2886_v32 = vld [vmem:[%s6942_s0 + $0x40] sm:$0xf0]  ;;  %v3460_v35 = vld [vmem:[%s6941_s2 + $0x460] sm:$0xf]  ;;  %v5195_v43 = vor.u32 %v4274_v26, %v2884_v25 }
  0x34   :  { %1130 = vmatpush.bf16.msrb.mxu0 %v3181_v36  ;;  %v4423_v36 = vld [vmem:[%s6941_s2 + $0x464] sm:$0xf0]  ;;  %v4294_v41 = vld [vmem:[%s6941_s2 + $0x64] sm:$0xf]  ;;  %v5197_v44 = vor.u32 %v4268_v27, %v2878_v30  ;;  %v3014_v46 = vld [vmem:[%s6941_s2 + $0xe8] sm:$0xf0]  ;;  %v5205_v47 = vor.u32 %v4269_v31, %v2886_v32 }
  0x35   :  { %1144 = vmatpush.bf16.msrb.mxu1 %v3245_v37  ;;  %v3524_v37 = vld [vmem:[%s6941_s2 + $0x4e0] sm:$0xf]  ;;  %v4439_v40 = vld [vmem:[%s6941_s2 + $0x4e4] sm:$0xf0]  ;;  %v4310_v45 = vld [vmem:[%s6941_s2 + $0xe4] sm:$0xf] }
  0x36   :  { %1158 = vmatpush.bf16.msrb.mxu2 %v3309_v38  ;;  %v3025_v38 = vor.u32 %v4312_v18, %v3022_v20  ;;  %v3525_v49 = vor.u32 %v4439_v40, %v3524_v37  ;;  %v4421_v52 = vld [vmem:[%s6941_s2 + $0x454] sm:$0xf0]  ;;  %v3516_v53 = vld [vmem:[%s6941_s2 + $0x4d0] sm:$0xf]  ;;  %v3017_v54 = vor.u32 %v4310_v45, %v3014_v46  ;;  %v4292_v56 = vld [vmem:[%s6941_s2 + $0x54] sm:$0xf] }
  0x37   :  { %1172 = vmatpush.bf16.msrb.mxu3 %v3373_v42  ;;  %v2950_v42 = vld [vmem:[%s6941_s2 + $0x68] sm:$0xf0]  ;;  %v2942_v57 = vld [vmem:[%s6941_s2 + $0x58] sm:$0xf0]  ;;  %v4308_v59 = vld [vmem:[%s6941_s2 + $0xd4] sm:$0xf] }
  0x38   :  { %1131 = vmatpush.bf16.msrb.mxu0 %v3173_v48  ;;  %v3461_v48 = vor.u32 %v4423_v36, %v3460_v35  ;;  %v3006_v60 = vld [vmem:[%s6941_s2 + $0xd8] sm:$0xf0]  ;;  %v3444_v0 = vld [vmem:[%s6941_s2 + $0x440] sm:$0xf]  ;;  %v4419_v2 = vld [vmem:[%s6941_s2 + $0x444] sm:$0xf0] }
  0x39   :  { %1145 = vmatpush.bf16.msrb.mxu1 %v3237_v50  ;;  %v2953_v50 = vor.u32 %v4294_v41, %v2950_v42  ;;  %v3508_v3 = vld [vmem:[%s6941_s2 + $0x4c0] sm:$0xf]  ;;  %v3009_v4 = vor.u32 %v4308_v59, %v3006_v60  ;;  %v2934_v7 = vld [vmem:[%s6941_s2 + $0x48] sm:$0xf0]  ;;  %v4306_v8 = vld [vmem:[%s6941_s2 + $0xc4] sm:$0xf] }
  0x3a   :  { %1159 = vmatpush.bf16.msrb.mxu2 %v3301_v51  ;;  %v3452_v51 = vld [vmem:[%s6941_s2 + $0x450] sm:$0xf]  ;;  %v2998_v9 = vld [vmem:[%s6941_s2 + $0xc8] sm:$0xf0]  ;;  %v4417_v15 = vld [vmem:[%s6941_s2 + $0x434] sm:$0xf0] }
  0x3b   :  { %1173 = vmatpush.bf16.msrb.mxu3 %v3365_v55  ;;  %v4437_v55 = vld [vmem:[%s6941_s2 + $0x4d4] sm:$0xf0]  ;;  %v3453_v61 = vor.u32 %v4421_v52, %v3452_v51  ;;  %v3436_v14 = vld [vmem:[%s6941_s2 + $0x430] sm:$0xf]  ;;  %v3001_v18 = vor.u32 %v4306_v8, %v2998_v9  ;;  %v4288_v20 = vld [vmem:[%s6941_s2 + $0x34] sm:$0xf] }
  0x3c   :  { %1132 = vmatpush.bf16.msrb.mxu0 %v3165_v63  ;;  %v3517_v62 = vor.u32 %v4437_v55, %v3516_v53  ;;  %v2945_v63 = vor.u32 %v4292_v56, %v2942_v57  ;;  %v3500_v16 = vld [vmem:[%s6941_s2 + $0x4b0] sm:$0xf]  ;;  %v2926_v21 = vld [vmem:[%s6941_s2 + $0x38] sm:$0xf0]  ;;  %v4304_v22 = vld [vmem:[%s6941_s2 + $0xb4] sm:$0xf] }
  0x3d   :  { %1146 = vmatpush.bf16.msrb.mxu1 %v3229_v5  ;;  %v4435_v5 = vld [vmem:[%s6941_s2 + $0x4c4] sm:$0xf0]  ;;  %v2929_v26 = vor.u32 %v4288_v20, %v2926_v21  ;;  %v3428_v27 = vld [vmem:[%s6941_s2 + $0x420] sm:$0xf]  ;;  %v4286_v32 = vld [vmem:[%s6941_s2 + $0x24] sm:$0xf] }
  0x3e   :  { %1160 = vmatpush.bf16.msrb.mxu2 %v3293_v6  ;;  %v4290_v6 = vld [vmem:[%s6941_s2 + $0x44] sm:$0xf]  ;;  %v3509_v12 = vor.u32 %v4435_v5, %v3508_v3  ;;  %v4431_v31 = vld [vmem:[%s6941_s2 + $0x4a4] sm:$0xf0]  ;;  %v2982_v35 = vld [vmem:[%s6941_s2 + $0xa8] sm:$0xf0] }
  0x3f   :  { %1174 = vmatpush.bf16.msrb.mxu3 %v3357_v11  ;;  %v3445_v11 = vor.u32 %v4419_v2, %v3444_v0  ;;  %v2937_v13 = vor.u32 %v4290_v6, %v2934_v7  ;;  %v3420_v40 = vld [vmem:[%s6941_s2 + $0x410] sm:$0xf]  ;;  %v4413_v41 = vld [vmem:[%s6941_s2 + $0x414] sm:$0xf0]  ;;  %v2974_v51 = vld [vmem:[%s6941_s2 + $0x98] sm:$0xf0] }
  0x40   :  { %1133 = vmatpush.bf16.msrb.mxu0 %v3157_v19  ;;  %v4433_v19 = vld [vmem:[%s6941_s2 + $0x4b4] sm:$0xf0]  ;;  %v3484_v42 = vld [vmem:[%s6941_s2 + $0x490] sm:$0xf]  ;;  %v3421_v52 = vor.u32 %v4413_v41, %v3420_v40  ;;  %v3412_v53 = vld [vmem:[%s6941_s2 + $0x400] sm:$0xf] }
  0x41   :  { %1147 = vmatpush.bf16.msrb.mxu1 %v3221_v23  ;;  %v2990_v23 = vld [vmem:[%s6941_s2 + $0xb8] sm:$0xf0]  ;;  %v3501_v25 = vor.u32 %v4433_v19, %v3500_v16  ;;  %v4429_v46 = vld [vmem:[%s6941_s2 + $0x494] sm:$0xf0]  ;;  %v3476_v55 = vld [vmem:[%s6941_s2 + $0x480] sm:$0xf] }
  0x42   :  { %1161 = vmatpush.bf16.msrb.mxu2 %v3285_v24  ;;  %v3437_v24 = vor.u32 %v4417_v15, %v3436_v14  ;;  %v2993_v30 = vor.u32 %v4304_v22, %v2990_v23  ;;  %v3485_v56 = vor.u32 %v4429_v46, %v3484_v42  ;;  %v4427_v59 = vld [vmem:[%s6941_s2 + $0x484] sm:$0xf0]  ;;  %v4282_v60 = vld [vmem:[%s6941_s2 + $0x4] sm:$0xf]  ;;  %v2966_v0 = vld [vmem:[%s6941_s2 + $0x88] sm:$0xf0] }
  0x43   :  { %1175 = vmatpush.bf16.msrb.mxu3 %v3349_v28  ;;  %1134 = vmatmul.bf16.vlgmr.msrb.gmra.mxu0 %v5184_v39  ;;  %v4415_v28 = vld [vmem:[%s6941_s2 + $0x424] sm:$0xf0]  ;;  %v4328_v2 = vld [vmem:[%s6941_s2 + $0x174] sm:$0xf]  ;;  %v3086_v3 = vld [vmem:[%s6941_s2 + $0x178] sm:$0xf0] }
  0x44   :  { %1182 = vmatpush.bf16.msra.mxu0 %v3469_v29  ;;  %1148 = vmatmul.bf16.vlgmr.msrb.gmra.mxu1 %v5197_v44  ;;  %v3492_v29 = vld [vmem:[%s6941_s2 + $0x4a0] sm:$0xf]  ;;  %v3429_v36 = vor.u32 %v4415_v28, %v3428_v27  ;;  %v3150_v5 = vld [vmem:[%s6941_s2 + $0x1f8] sm:$0xf0]  ;;  %v4360_v7 = vld [vmem:[%s6941_s2 + $0x274] sm:$0xf] }
  0x45   :  { %1196 = vmatpush.bf16.msra.mxu1 %v3533_v33  ;;  %1162 = vmatmul.bf16.vlgmr.msrb.gmra.mxu2 %v5195_v43  ;;  %v2918_v33 = vld [vmem:[%s6941_s2 + $0x28] sm:$0xf0]  ;;  %v3493_v37 = vor.u32 %v4431_v31, %v3492_v29  ;;  %v3214_v8 = vld [vmem:[%s6941_s2 + $0x278] sm:$0xf0]  ;;  %v4376_v9 = vld [vmem:[%s6941_s2 + $0x2f4] sm:$0xf] }
  0x46   :  { %1210 = vmatpush.bf16.msra.mxu2 %v2961_v34  ;;  %1176 = vmatmul.bf16.vlgmr.msrb.gmra.mxu3 %v5205_v47  ;;  %v4302_v34 = vld [vmem:[%s6941_s2 + $0xa4] sm:$0xf]  ;;  %v2892_v14 = vld [vmem:[%s6942_s0 + $0x20] sm:$0xf]  ;;  %v4275_v15 = vld [vmem:[%s6942_s0 + $0x44] sm:$0xf0]  ;;  %v3217_v22 = vor.u32 %v4360_v7, %v3214_v8 }
  0x47   :  { %1224 = vmatpush.bf16.msra.mxu3 %v3025_v38  ;;  %v2921_v38 = vor.u32 %v4286_v32, %v2918_v33  ;;  %v2985_v45 = vor.u32 %v4302_v34, %v2982_v35  ;;  %v4270_v19 = vld [vmem:[%s6942_s0 + $0x24] sm:$0xf]  ;;  %v2894_v20 = vld [vmem:[%s6942_s0 + $0x48] sm:$0xf0]  ;;  %v5400_v27 = vor.u32 %v4275_v15, %v2892_v14  ;;  %v4340_v40 = vld [vmem:[%s6941_s2 + $0x1d4] sm:$0xf] }
  0x48   :  { %1183 = vmatpush.bf16.msra.mxu0 %v3461_v48  ;;  %v4284_v48 = vld [vmem:[%s6941_s2 + $0x14] sm:$0xf]  ;;  %v4326_v23 = vld [vmem:[%s6941_s2 + $0x164] sm:$0xf]  ;;  %v3142_v28 = vld [vmem:[%s6941_s2 + $0x1e8] sm:$0xf0]  ;;  %v5411_v31 = vor.u32 %v4270_v19, %v2894_v20 }
  0x49   :  { %1197 = vmatpush.bf16.msra.mxu1 %v3525_v49  ;;  %v2910_v49 = vld [vmem:[%s6941_s2 + $0x18] sm:$0xf0]  ;;  %v4358_v29 = vld [vmem:[%s6941_s2 + $0x264] sm:$0xf]  ;;  %v3270_v33 = vld [vmem:[%s6941_s2 + $0x2e8] sm:$0xf0] }
  0x4a   :  { %1211 = vmatpush.bf16.msra.mxu2 %v2953_v50  ;;  %v4300_v50 = vld [vmem:[%s6941_s2 + $0x94] sm:$0xf]  ;;  %v2913_v57 = vor.u32 %v4284_v48, %v2910_v49  ;;  %v4374_v32 = vld [vmem:[%s6941_s2 + $0x2e4] sm:$0xf]  ;;  %v3134_v42 = vld [vmem:[%s6941_s2 + $0x1d8] sm:$0xf0] }
  0x4b   :  { %1225 = vmatpush.bf16.msra.mxu3 %v3017_v54  ;;  %v4411_v54 = vld [vmem:[%s6941_s2 + $0x404] sm:$0xf0]  ;;  %v3273_v41 = vor.u32 %v4374_v32, %v3270_v33  ;;  %v3198_v46 = vld [vmem:[%s6941_s2 + $0x258] sm:$0xf0]  ;;  %v4372_v48 = vld [vmem:[%s6941_s2 + $0x2d4] sm:$0xf] }
  0x4c   :  { %1184 = vmatpush.bf16.msra.mxu0 %v3453_v61  ;;  %v2902_v61 = vld [vmem:[%s6941_s2 + $0x8] sm:$0xf0]  ;;  %v3413_v6 = vor.u32 %v4411_v54, %v3412_v53  ;;  %v3262_v49 = vld [vmem:[%s6941_s2 + $0x2d8] sm:$0xf0]  ;;  %v4322_v53 = vld [vmem:[%s6941_s2 + $0x144] sm:$0xf] }
  0x4d   :  { %1198 = vmatpush.bf16.msra.mxu1 %v3517_v62  ;;  %v2977_v62 = vor.u32 %v4300_v50, %v2974_v51  ;;  %v3137_v51 = vor.u32 %v4340_v40, %v3134_v42  ;;  %v3062_v54 = vld [vmem:[%s6941_s2 + $0x148] sm:$0xf0]  ;;  %v3182_v7 = vld [vmem:[%s6941_s2 + $0x238] sm:$0xf0]  ;;  %v4368_v8 = vld [vmem:[%s6941_s2 + $0x2b4] sm:$0xf] }
  0x4e   :  { %1212 = vmatpush.bf16.msra.mxu2 %v2945_v63  ;;  %v4298_v63 = vld [vmem:[%s6941_s2 + $0x84] sm:$0xf]  ;;  %v3046_v15 = vld [vmem:[%s6941_s2 + $0x128] sm:$0xf0]  ;;  %v3102_v33 = vld [vmem:[%s6941_s2 + $0x198] sm:$0xf0] }
  0x4f   :  { %1226 = vmatpush.bf16.msra.mxu3 %v3009_v4  ;;  %v4344_v4 = vld [vmem:[%s6941_s2 + $0x1f4] sm:$0xf]  ;;  %v2969_v16 = vor.u32 %v4298_v63, %v2966_v0  ;;  %v4318_v14 = vld [vmem:[%s6941_s2 + $0x124] sm:$0xf]  ;;  %v3110_v19 = vld [vmem:[%s6941_s2 + $0x1a8] sm:$0xf0] }
  0x50   :  { %1185 = vmatpush.bf16.msra.mxu0 %v3445_v11  ;;  %v3477_v11 = vor.u32 %v4427_v59, %v3476_v55  ;;  %v3153_v21 = vor.u32 %v4344_v4, %v3150_v5  ;;  %v3265_v55 = vor.u32 %v4372_v48, %v3262_v49  ;;  %v4370_v59 = vld [vmem:[%s6941_s2 + $0x2c4] sm:$0xf]  ;;  %v4320_v0 = vld [vmem:[%s6941_s2 + $0x134] sm:$0xf]  ;;  %v3118_v5 = vld [vmem:[%s6941_s2 + $0x1b8] sm:$0xf0] }
  0x51   :  { %1199 = vmatpush.bf16.msra.mxu1 %v3509_v12  ;;  %v2905_v12 = vor.u32 %v4282_v60, %v2902_v61  ;;  %v3254_v60 = vld [vmem:[%s6941_s2 + $0x2c8] sm:$0xf0]  ;;  %v3065_v61 = vor.u32 %v4322_v53, %v3062_v54  ;;  %v4350_v20 = vld [vmem:[%s6941_s2 + $0x224] sm:$0xf]  ;;  %v4392_v54 = vld [vmem:[%s6941_s2 + $0x374] sm:$0xf] }
  0x52   :  { %1213 = vmatpush.bf16.msra.mxu2 %v2937_v13  ;;  %v3278_v13 = vld [vmem:[%s6941_s2 + $0x2f8] sm:$0xf0]  ;;  %v3257_v4 = vor.u32 %v4370_v59, %v3254_v60  ;;  %v4314_v40 = vld [vmem:[%s6941_s2 + $0x104] sm:$0xf]  ;;  %v3094_v48 = vld [vmem:[%s6941_s2 + $0x188] sm:$0xf0] }
  0x53   :  { %1227 = vmatpush.bf16.msra.mxu3 %v3001_v18  ;;  %v3089_v18 = vor.u32 %v4328_v2, %v3086_v3  ;;  %v3054_v2 = vld [vmem:[%s6941_s2 + $0x138] sm:$0xf0]  ;;  %v4336_v3 = vld [vmem:[%s6941_s2 + $0x1b4] sm:$0xf]  ;;  %v4346_v49 = vld [vmem:[%s6941_s2 + $0x204] sm:$0xf] }
  0x54   :  { %1186 = vmatpush.bf16.msra.mxu0 %v3437_v24  ;;  %v3078_v24 = vld [vmem:[%s6941_s2 + $0x168] sm:$0xf0]  ;;  %v3470_v59 = vld [vmem:[%s6941_s2 + $0x478] sm:$0xf0] }
  0x55   :  { %1200 = vmatpush.bf16.msra.mxu1 %v3501_v25  ;;  %v4342_v25 = vld [vmem:[%s6941_s2 + $0x1e4] sm:$0xf]  ;;  %v3081_v34 = vor.u32 %v4326_v23, %v3078_v24  ;;  %v3238_v23 = vld [vmem:[%s6941_s2 + $0x2a8] sm:$0xf0]  ;;  %v3049_v24 = vor.u32 %v4318_v14, %v3046_v15 }
  0x56   :  { %1214 = vmatpush.bf16.msra.mxu2 %v2929_v26  ;;  %v3281_v26 = vor.u32 %v4376_v9, %v3278_v13  ;;  %v3145_v35 = vor.u32 %v4342_v25, %v3142_v28  ;;  %v3246_v9 = vld [vmem:[%s6941_s2 + $0x2b8] sm:$0xf0]  ;;  %v4316_v28 = vld [vmem:[%s6941_s2 + $0x114] sm:$0xf]  ;;  %v3222_v53 = vld [vmem:[%s6941_s2 + $0x288] sm:$0xf0] }
  0x57   :  { %1228 = vmatpush.bf16.msra.mxu3 %v2993_v30  ;;  %v3206_v30 = vld [vmem:[%s6941_s2 + $0x268] sm:$0xf0] }
  0x58   :  { %1187 = vmatpush.bf16.msra.mxu0 %v3429_v36  ;;  %v3209_v36 = vor.u32 %v4358_v29, %v3206_v30  ;;  %v3038_v29 = vld [vmem:[%s6941_s2 + $0x118] sm:$0xf0]  ;;  %v4332_v30 = vld [vmem:[%s6941_s2 + $0x194] sm:$0xf]  ;;  %v3526_v14 = vld [vmem:[%s6941_s2 + $0x4e8] sm:$0xf0] }
  0x59   :  { %1201 = vmatpush.bf16.msra.mxu1 %v3493_v37  ;;  %v4324_v37 = vld [vmem:[%s6941_s2 + $0x154] sm:$0xf]  ;;  %v3105_v42 = vor.u32 %v4332_v30, %v3102_v33  ;;  %v3382_v33 = vld [vmem:[%s6941_s2 + $0x3c8] sm:$0xf0] }
  0x5a   :  { %1215 = vmatpush.bf16.msra.mxu2 %v2921_v38  ;;  %v3070_v38 = vld [vmem:[%s6941_s2 + $0x158] sm:$0xf0] }
  0x5b   :  { %1229 = vmatpush.bf16.msra.mxu3 %v2985_v45  ;;  %v4356_v45 = vld [vmem:[%s6941_s2 + $0x254] sm:$0xf]  ;;  %v3073_v50 = vor.u32 %v4324_v37, %v3070_v38  ;;  %v3230_v37 = vld [vmem:[%s6941_s2 + $0x298] sm:$0xf0]  ;;  %v3041_v38 = vor.u32 %v4316_v28, %v3038_v29 }
  0x5c   :  { %1188 = vmatpush.bf16.msra.mxu0 %v3421_v52  ;;  %v3201_v52 = vor.u32 %v4356_v45, %v3198_v46  ;;  %v4330_v46 = vld [vmem:[%s6941_s2 + $0x184] sm:$0xf] }
  0x5d   :  { %1202 = vmatpush.bf16.msra.mxu1 %v3485_v56  ;;  %v4354_v56 = vld [vmem:[%s6941_s2 + $0x244] sm:$0xf]  ;;  %v3097_v60 = vor.u32 %v4330_v46, %v3094_v48  ;;  %v4400_v46 = vld [vmem:[%s6941_s2 + $0x3b4] sm:$0xf] }
  0x5e   :  { %1216 = vmatpush.bf16.msra.mxu2 %v2913_v57  ;;  %v3190_v57 = vld [vmem:[%s6941_s2 + $0x248] sm:$0xf0] }
  0x5f   :  { %1230 = vmatpush.bf16.msra.mxu3 %v2977_v62  ;;  %v3193_v63 = vor.u32 %v4354_v56, %v3190_v57  ;;  %v3406_v56 = vld [vmem:[%s6941_s2 + $0x3f8] sm:$0xf0]  ;;  %v4424_v57 = vld [vmem:[%s6941_s2 + $0x474] sm:$0xf] }
  0x60   :  { %1189 = vmatpush.bf16.msra.mxu0 %v3413_v6  ;;  %v4352_v6 = vld [vmem:[%s6941_s2 + $0x234] sm:$0xf] }
  0x61   :  { %1203 = vmatpush.bf16.msra.mxu1 %v3477_v11  ;;  %v3057_v11 = vor.u32 %v4320_v0, %v3054_v2  ;;  %v3185_v13 = vor.u32 %v4352_v6, %v3182_v7  ;;  %v3334_v6 = vld [vmem:[%s6941_s2 + $0x368] sm:$0xf0]  ;;  %v4406_v7 = vld [vmem:[%s6941_s2 + $0x3e4] sm:$0xf] }
  0x62   :  { %1217 = vmatpush.bf16.msra.mxu2 %v2905_v12  ;;  %v3121_v12 = vor.u32 %v4336_v3, %v3118_v5  ;;  %v4390_v5 = vld [vmem:[%s6941_s2 + $0x364] sm:$0xf] }
  0x63   :  { %1231 = vmatpush.bf16.msra.mxu3 %v2969_v16  ;;  %1190 = vmatmul.bf16.vlgmr.msra.gmra.mxu0 %v5400_v27  ;;  %v4334_v16 = vld [vmem:[%s6941_s2 + $0x1a4] sm:$0xf]  ;;  %v3337_v15 = vor.u32 %v4390_v5, %v3334_v6  ;;  %v4380_v5 = vld [vmem:[%s6941_s2 + $0x314] sm:$0xf]  ;;  %v3294_v6 = vld [vmem:[%s6941_s2 + $0x318] sm:$0xf0] }
  0x64   :  { %1238 = vmatpush.bf16.msrb.mxu0 %v3089_v18  ;;  %1204 = vmatmul.bf16.vlgmr.msra.gmra.mxu1 %v5411_v31  ;;  %v3249_v18 = vor.u32 %v4368_v8, %v3246_v9  ;;  %v3113_v25 = vor.u32 %v4334_v16, %v3110_v19  ;;  %v3398_v9 = vld [vmem:[%s6941_s2 + $0x3e8] sm:$0xf0]  ;;  %v4388_v19 = vld [vmem:[%s6941_s2 + $0x354] sm:$0xf] }
  0x65   :  { %1252 = vmatpush.bf16.msrb.mxu1 %v3153_v21  ;;  %1218 = vmatmul.bf16.vlgmr.msra.gmra.mxu2 %v4962_v58  ;;  %v4338_v58 = vld [vmem:[%s6941_s2 + $0x1c4] sm:$0xf]  ;;  %v3174_v21 = vld [vmem:[%s6941_s2 + $0x228] sm:$0xf0]  ;;  %v3401_v16 = vor.u32 %v4406_v7, %v3398_v9  ;;  %v4396_v7 = vld [vmem:[%s6941_s2 + $0x394] sm:$0xf] }
  0x66   :  { %1266 = vmatpush.bf16.msrb.mxu2 %v3217_v22  ;;  %1232 = vmatmul.bf16.vlgmr.msra.gmra.mxu3 %v4998_v10  ;;  %v3126_v10 = vld [vmem:[%s6941_s2 + $0x1c8] sm:$0xf0]  ;;  %v4366_v22 = vld [vmem:[%s6941_s2 + $0x2a4] sm:$0xf]  ;;  %v3358_v9 = vld [vmem:[%s6941_s2 + $0x398] sm:$0xf0] }
  0x67   :  { %1280 = vmatpush.bf16.msrb.mxu3 %v3281_v26  ;;  %v3129_v62 = vor.u32 %v4338_v58, %v3126_v10  ;;  %v3177_v26 = vor.u32 %v4350_v20, %v3174_v21  ;;  %v3241_v32 = vor.u32 %v4366_v22, %v3238_v23  ;;  %v3342_v58 = vld [vmem:[%s6941_s2 + $0x378] sm:$0xf0]  ;;  %v4404_v21 = vld [vmem:[%s6941_s2 + $0x3d4] sm:$0xf] }
  0x68   :  { %1239 = vmatpush.bf16.msrb.mxu0 %v3081_v34  ;;  %v4348_v34 = vld [vmem:[%s6941_s2 + $0x214] sm:$0xf]  ;;  %v3345_v2 = vor.u32 %v4392_v54, %v3342_v58  ;;  %v3326_v20 = vld [vmem:[%s6941_s2 + $0x358] sm:$0xf0] }
  0x69   :  { %1253 = vmatpush.bf16.msrb.mxu1 %v3145_v35  ;;  %v3166_v35 = vld [vmem:[%s6941_s2 + $0x218] sm:$0xf0]  ;;  %v3329_v28 = vor.u32 %v4388_v19, %v3326_v20  ;;  %v3361_v19 = vor.u32 %v4396_v7, %v3358_v9  ;;  %v4467_v7 = vld [vmem:[%s6943_s4 + $0xc4] sm:$0xf0] }
  0x6a   :  { %1267 = vmatpush.bf16.msrb.mxu2 %v3209_v36  ;;  %v4364_v36 = vld [vmem:[%s6941_s2 + $0x294] sm:$0xf]  ;;  %v3169_v45 = vor.u32 %v4348_v34, %v3166_v35  ;;  %v3390_v23 = vld [vmem:[%s6941_s2 + $0x3d8] sm:$0xf0]  ;;  %v4418_v34 = vld [vmem:[%s6941_s2 + $0x444] sm:$0xf] }
  0x6b   :  { %1281 = vmatpush.bf16.msrb.mxu3 %v3273_v41  ;;  %v3030_v41 = vld [vmem:[%s6941_s2 + $0x108] sm:$0xf0]  ;;  %v3393_v29 = vor.u32 %v4404_v21, %v3390_v23  ;;  %v4394_v21 = vld [vmem:[%s6941_s2 + $0x384] sm:$0xf]  ;;  %v4483_v9 = vld [vmem:[%s6943_s4 + $0x144] sm:$0xf0] }
  0x6c   :  { %1240 = vmatpush.bf16.msrb.mxu0 %v3073_v50  ;;  %v3233_v50 = vor.u32 %v4364_v36, %v3230_v37  ;;  %v3033_v10 = vor.u32 %v4314_v40, %v3030_v41  ;;  %v3446_v35 = vld [vmem:[%s6941_s2 + $0x448] sm:$0xf0]  ;;  %v4434_v36 = vld [vmem:[%s6941_s2 + $0x4c4] sm:$0xf] }
  0x6d   :  { %1254 = vmatpush.bf16.msrb.mxu1 %v3137_v51  ;;  %v3158_v51 = vld [vmem:[%s6941_s2 + $0x208] sm:$0xf0]  ;;  %v3449_v41 = vor.u32 %v4418_v34, %v3446_v35  ;;  %v4410_v23 = vld [vmem:[%s6941_s2 + $0x404] sm:$0xf]  ;;  %v3812_v35 = vld [vmem:[%s6943_s4 + $0x1f0] sm:$0xf] }
  0x6e   :  { %1268 = vmatpush.bf16.msrb.mxu2 %v3201_v52  ;;  %v4362_v52 = vld [vmem:[%s6941_s2 + $0x284] sm:$0xf]  ;;  %v3510_v37 = vld [vmem:[%s6941_s2 + $0x4c8] sm:$0xf0] }
  0x6f   :  { %1282 = vmatpush.bf16.msrb.mxu3 %v3265_v55  ;;  %v4408_v55 = vld [vmem:[%s6941_s2 + $0x3f4] sm:$0xf]  ;;  %v3225_v0 = vor.u32 %v4362_v52, %v3222_v53  ;;  %v3513_v48 = vor.u32 %v4434_v36, %v3510_v37  ;;  %v3502_v53 = vld [vmem:[%s6941_s2 + $0x4b8] sm:$0xf0]  ;;  %v4505_v36 = vld [vmem:[%s6943_s4 + $0x1f4] sm:$0xf0] }
  0x70   :  { %1241 = vmatpush.bf16.msrb.mxu0 %v3065_v61  ;;  %v3161_v61 = vor.u32 %v4346_v49, %v3158_v51  ;;  %v3409_v3 = vor.u32 %v4408_v55, %v3406_v56  ;;  %v3374_v49 = vld [vmem:[%s6941_s2 + $0x3b8] sm:$0xf0]  ;;  %v4432_v52 = vld [vmem:[%s6941_s2 + $0x4b4] sm:$0xf]  ;;  %v3302_v56 = vld [vmem:[%s6941_s2 + $0x328] sm:$0xf0] }
  0x71   :  { %1255 = vmatpush.bf16.msrb.mxu1 %v3129_v62  ;;  %v4440_v62 = vld [vmem:[%s6941_s2 + $0x4f4] sm:$0xf]  ;;  %v3438_v51 = vld [vmem:[%s6941_s2 + $0x438] sm:$0xf0]  ;;  %v3377_v58 = vor.u32 %v4400_v46, %v3374_v49  ;;  %v3676_v46 = vld [vmem:[%s6943_s4 + $0xe0] sm:$0xf] }
  0x72   :  { %1269 = vmatpush.bf16.msrb.mxu2 %v3193_v63  ;;  %v3534_v63 = vld [vmem:[%s6941_s2 + $0x4f8] sm:$0xf0]  ;;  %v4471_v49 = vld [vmem:[%s6943_s4 + $0xe4] sm:$0xf0] }
  0x73   :  { %1283 = vmatpush.bf16.msrb.mxu3 %v3257_v4  ;;  %v3473_v4 = vor.u32 %v4424_v57, %v3470_v59  ;;  %v3537_v8 = vor.u32 %v4440_v62, %v3534_v63  ;;  %v4398_v57 = vld [vmem:[%s6941_s2 + $0x3a4] sm:$0xf]  ;;  %v3505_v59 = vor.u32 %v4432_v52, %v3502_v53  ;;  %v3430_v62 = vld [vmem:[%s6941_s2 + $0x428] sm:$0xf0]  ;;  %v3804_v52 = vld [vmem:[%s6943_s4 + $0x1e0] sm:$0xf] }
  0x74   :  { %1242 = vmatpush.bf16.msrb.mxu0 %v3057_v11  ;;  %v4422_v11 = vld [vmem:[%s6941_s2 + $0x464] sm:$0xf]  ;;  %v4503_v53 = vld [vmem:[%s6943_s4 + $0x1e4] sm:$0xf0] }
  0x75   :  { %1256 = vmatpush.bf16.msrb.mxu1 %v3121_v12  ;;  %v3462_v12 = vld [vmem:[%s6941_s2 + $0x468] sm:$0xf0]  ;;  %v4430_v63 = vld [vmem:[%s6941_s2 + $0x4a4] sm:$0xf] }
  0x76   :  { %1270 = vmatpush.bf16.msrb.mxu2 %v3185_v13  ;;  %v4438_v13 = vld [vmem:[%s6941_s2 + $0x4e4] sm:$0xf] }
  0x77   :  { %1284 = vmatpush.bf16.msrb.mxu3 %v3249_v18  ;;  %v3465_v18 = vor.u32 %v4422_v11, %v3462_v12  ;;  %v3529_v22 = vor.u32 %v4438_v13, %v3526_v14  ;;  %v4412_v11 = vld [vmem:[%s6941_s2 + $0x414] sm:$0xf]  ;;  %v3422_v12 = vld [vmem:[%s6941_s2 + $0x418] sm:$0xf0] }
  0x78   :  { %1243 = vmatpush.bf16.msrb.mxu0 %v3049_v24  ;;  %v4420_v24 = vld [vmem:[%s6941_s2 + $0x454] sm:$0xf]  ;;  %v3486_v14 = vld [vmem:[%s6941_s2 + $0x498] sm:$0xf0]  ;;  %v3425_v20 = vor.u32 %v4412_v11, %v3422_v12  ;;  %v3788_v11 = vld [vmem:[%s6943_s4 + $0x1c0] sm:$0xf] }
  0x79   :  { %1257 = vmatpush.bf16.msrb.mxu1 %v3113_v25  ;;  %v3454_v25 = vld [vmem:[%s6941_s2 + $0x458] sm:$0xf0]  ;;  %v4428_v13 = vld [vmem:[%s6941_s2 + $0x494] sm:$0xf]  ;;  %v4499_v12 = vld [vmem:[%s6943_s4 + $0x1c4] sm:$0xf0] }
  0x7a   :  { %1271 = vmatpush.bf16.msrb.mxu2 %v3177_v26  ;;  %v3518_v26 = vld [vmem:[%s6941_s2 + $0x4d8] sm:$0xf0]  ;;  %v3457_v30 = vor.u32 %v4420_v24, %v3454_v25  ;;  %v3489_v24 = vor.u32 %v4428_v13, %v3486_v14  ;;  %v3414_v25 = vld [vmem:[%s6941_s2 + $0x408] sm:$0xf0] }
  0x7b   :  { %1285 = vmatpush.bf16.msrb.mxu3 %v3241_v32  ;;  %v4402_v32 = vld [vmem:[%s6941_s2 + $0x3c4] sm:$0xf]  ;;  %v3417_v34 = vor.u32 %v4410_v23, %v3414_v25  ;;  %v4465_v23 = vld [vmem:[%s6943_s4 + $0xb4] sm:$0xf0] }
  0x7c   :  { %1244 = vmatpush.bf16.msrb.mxu0 %v3041_v38  ;;  %v3385_v40 = vor.u32 %v4402_v32, %v3382_v33  ;;  %v3748_v32 = vld [vmem:[%s6943_s4 + $0x170] sm:$0xf]  ;;  %v4481_v25 = vld [vmem:[%s6943_s4 + $0x134] sm:$0xf0] }
  0x7d   :  { %1258 = vmatpush.bf16.msrb.mxu1 %v3105_v42  ;;  %v4384_v42 = vld [vmem:[%s6941_s2 + $0x334] sm:$0xf] }
  0x7e   :  { %1272 = vmatpush.bf16.msrb.mxu2 %v3169_v45  ;;  %v3310_v45 = vld [vmem:[%s6941_s2 + $0x338] sm:$0xf0] }
  0x7f   :  { %1286 = vmatpush.bf16.msrb.mxu3 %v3233_v50  ;;  %v4416_v50 = vld [vmem:[%s6941_s2 + $0x434] sm:$0xf]  ;;  %v3313_v54 = vor.u32 %v4384_v42, %v3310_v45  ;;  %v3612_v42 = vld [vmem:[%s6943_s4 + $0x60] sm:$0xf]  ;;  %v4455_v45 = vld [vmem:[%s6943_s4 + $0x64] sm:$0xf0] }
  0x80   :  { %1245 = vmatpush.bf16.msrb.mxu0 %v3033_v10  ;;  %v3441_v55 = vor.u32 %v4416_v50, %v3438_v51  ;;  %v4382_v10 = vld [vmem:[%s6941_s2 + $0x324] sm:$0xf]  ;;  %v3740_v50 = vld [vmem:[%s6943_s4 + $0x160] sm:$0xf]  ;;  %v4487_v51 = vld [vmem:[%s6943_s4 + $0x164] sm:$0xf0] }
  0x81   :  { %1259 = vmatpush.bf16.msrb.mxu1 %v3097_v60  ;;  %v3366_v60 = vld [vmem:[%s6941_s2 + $0x3a8] sm:$0xf0] }
  0x82   :  { %1273 = vmatpush.bf16.msrb.mxu2 %v3161_v61  ;;  %v4414_v61 = vld [vmem:[%s6941_s2 + $0x424] sm:$0xf] }
  0x83   :  { %1287 = vmatpush.bf16.msrb.mxu3 %v3225_v0  ;;  %1246 = vmatmul.bf16.vlgmr.msrb.gmra.mxu0 %v4976_v1  ;;  %v4436_v1 = vld [vmem:[%s6941_s2 + $0x4d4] sm:$0xf]  ;;  %v3494_v0 = vld [vmem:[%s6941_s2 + $0x4a8] sm:$0xf0] }
  0x84   :  { %1294 = vmatpush.bf16.msra.mxu0 %v3345_v2  ;;  %1260 = vmatmul.bf16.vlgmr.msrb.gmra.mxu1 %v5012_v17  ;;  %v4386_v17 = vld [vmem:[%s6941_s2 + $0x344] sm:$0xf]  ;;  %v3305_v2 = vor.u32 %v4382_v10, %v3302_v56  ;;  %v3741_v10 = vor.u32 %v4487_v51, %v3740_v50  ;;  %v4453_v56 = vld [vmem:[%s6943_s4 + $0x54] sm:$0xf0]  ;;  %v3572_v51 = vld [vmem:[%s6943_s4 + $0x10] sm:$0xf] }
  0x85   :  { %1308 = vmatpush.bf16.msra.mxu1 %v3409_v3  ;;  %1274 = vmatmul.bf16.vlgmr.msrb.gmra.mxu2 %v5184_v39  ;;  %v3318_v39 = vld [vmem:[%s6941_s2 + $0x348] sm:$0xf0]  ;;  %v3369_v3 = vor.u32 %v4398_v57, %v3366_v60  ;;  %v3668_v57 = vld [vmem:[%s6943_s4 + $0xd0] sm:$0xf]  ;;  %v3805_v60 = vor.u32 %v4503_v53, %v3804_v52  ;;  %v4445_v52 = vld [vmem:[%s6943_s4 + $0x14] sm:$0xf0] }
  0x86   :  { %1322 = vmatpush.bf16.msra.mxu2 %v3473_v4  ;;  %1288 = vmatmul.bf16.vlgmr.msrb.gmra.mxu3 %v5197_v44  ;;  %v3521_v44 = vor.u32 %v4436_v1, %v3518_v26  ;;  %v3321_v38 = vor.u32 %v4386_v17, %v3318_v39  ;;  %v3433_v4 = vor.u32 %v4414_v61, %v3430_v62  ;;  %v4426_v1 = vld [vmem:[%s6941_s2 + $0x484] sm:$0xf]  ;;  %v3478_v26 = vld [vmem:[%s6941_s2 + $0x488] sm:$0xf0]  ;;  %v4473_v39 = vld [vmem:[%s6943_s4 + $0xf4] sm:$0xf0] }
  0x87   :  { %1336 = vmatpush.bf16.msra.mxu3 %v3537_v8  ;;  %v3497_v8 = vor.u32 %v4430_v63, %v3494_v0  ;;  %v3481_v37 = vor.u32 %v4426_v1, %v3478_v26  ;;  %v4469_v61 = vld [vmem:[%s6943_s4 + $0xd4] sm:$0xf0]  ;;  %v3732_v62 = vld [vmem:[%s6943_s4 + $0x150] sm:$0xf] }
  0x88   :  { %1295 = vmatpush.bf16.msra.mxu0 %v3337_v15  ;;  %v3297_v15 = vor.u32 %v4380_v5, %v3294_v6  ;;  %v4485_v63 = vld [vmem:[%s6943_s4 + $0x154] sm:$0xf0]  ;;  %v4451_v5 = vld [vmem:[%s6943_s4 + $0x44] sm:$0xf0]  ;;  %v3780_v1 = vld [vmem:[%s6943_s4 + $0x1b0] sm:$0xf] }
  0x89   :  { %1309 = vmatpush.bf16.msra.mxu1 %v3401_v16  ;;  %v4378_v16 = vld [vmem:[%s6941_s2 + $0x304] sm:$0xf]  ;;  %v4501_v0 = vld [vmem:[%s6943_s4 + $0x1d4] sm:$0xf0]  ;;  %v3636_v53 = vld [vmem:[%s6943_s4 + $0x90] sm:$0xf] }
  0x8a   :  { %1323 = vmatpush.bf16.msra.mxu2 %v3465_v18  ;;  %v3286_v18 = vld [vmem:[%s6941_s2 + $0x308] sm:$0xf0]  ;;  %v4497_v26 = vld [vmem:[%s6943_s4 + $0x1b4] sm:$0xf0] }
  0x8b   :  { %1337 = vmatpush.bf16.msra.mxu3 %v3529_v22  ;;  %v3350_v22 = vld [vmem:[%s6941_s2 + $0x388] sm:$0xf0]  ;;  %v3289_v17 = vor.u32 %v4378_v16, %v3286_v18 }
  0x8c   :  { %1296 = vmatpush.bf16.msra.mxu0 %v3329_v28  ;;  %v3620_v28 = vld [vmem:[%s6943_s4 + $0x70] sm:$0xf]  ;;  %v3353_v33 = vor.u32 %v4394_v21, %v3350_v22  ;;  %v3789_v22 = vor.u32 %v4499_v12, %v3788_v11  ;;  %v4521_v11 = vld [vmem:[%s6943_s4 + $0x274] sm:$0xf0] }
  0x8d   :  { %1310 = vmatpush.bf16.msra.mxu1 %v3393_v29  ;;  %v4457_v29 = vld [vmem:[%s6943_s4 + $0x74] sm:$0xf0]  ;;  %v3652_v21 = vld [vmem:[%s6943_s4 + $0xb0] sm:$0xf] }
  0x8e   :  { %1324 = vmatpush.bf16.msra.mxu2 %v3457_v30  ;;  %v3684_v30 = vld [vmem:[%s6943_s4 + $0xf0] sm:$0xf] }
  0x8f   :  { %1338 = vmatpush.bf16.msra.mxu3 %v3521_v44  ;;  %v4489_v44 = vld [vmem:[%s6943_s4 + $0x174] sm:$0xf0] }
  0x90   :  { %1297 = vmatpush.bf16.msra.mxu0 %v3321_v38  ;;  %v3621_v38 = vor.u32 %v4457_v29, %v3620_v28 }
  0x91   :  { %1311 = vmatpush.bf16.msra.mxu1 %v3385_v40  ;;  %v3685_v40 = vor.u32 %v4473_v39, %v3684_v30 }
  0x92   :  { %1325 = vmatpush.bf16.msra.mxu2 %v3449_v41  ;;  %v3749_v41 = vor.u32 %v4489_v44, %v3748_v32  ;;  %v3580_v32 = vld [vmem:[%s6943_s4 + $0x20] sm:$0xf]  ;;  %v4447_v44 = vld [vmem:[%s6943_s4 + $0x24] sm:$0xf0] }
  0x93   :  { %1339 = vmatpush.bf16.msra.mxu3 %v3513_v48  ;;  %v3813_v48 = vor.u32 %v4505_v36, %v3812_v35  ;;  %v4463_v35 = vld [vmem:[%s6943_s4 + $0xa4] sm:$0xf0]  ;;  %v3708_v36 = vld [vmem:[%s6943_s4 + $0x120] sm:$0xf] }
  0x94   :  { %1298 = vmatpush.bf16.msra.mxu0 %v3313_v54  ;;  %v3613_v54 = vor.u32 %v4455_v45, %v3612_v42 }
  0x95   :  { %1312 = vmatpush.bf16.msra.mxu1 %v3377_v58  ;;  %v3604_v58 = vld [vmem:[%s6943_s4 + $0x50] sm:$0xf] }
  0x96   :  { %1326 = vmatpush.bf16.msra.mxu2 %v3441_v55  ;;  %v3677_v55 = vor.u32 %v4471_v49, %v3676_v46  ;;  %v3581_v46 = vor.u32 %v4447_v44, %v3580_v32  ;;  %v3548_v32 = vld [vmem:[%s6945_s1 + $0x8] sm:$0xf]  ;;  %v4280_v44 = vld [vmem:[%s6945_s1 + $0x1c] sm:$0xf0] }
  0x97   :  { %1340 = vmatpush.bf16.msra.mxu3 %v3505_v59  ;;  %v5823_v59 = vld [vmem:[%s6944_s3] sm:$0x3] }
  0x98   :  { %1299 = vmatpush.bf16.msra.mxu0 %v3305_v2  ;;  %v3605_v2 = vor.u32 %v4453_v56, %v3604_v58  ;;  %v4461_v58 = vld [vmem:[%s6943_s4 + $0x94] sm:$0xf0] }
  0x99   :  { %1313 = vmatpush.bf16.msra.mxu1 %v3369_v3  ;;  %v216_v3 = vperm.slane %v5823_v59, 0 }
  0x9a   :  { %1327 = vmatpush.bf16.msra.mxu2 %v3433_v4  ;;  %v3669_v4 = vor.u32 %v4469_v61, %v3668_v57  ;;  %v3764_v57 = vld [vmem:[%s6943_s4 + $0x190] sm:$0xf]  ;;  %v3564_v61 = vld [vmem:[%s6943_s4] sm:$0xf] }
  0x9b   :  { %1341 = vmatpush.bf16.msra.mxu3 %v3497_v8  ;;  %v3724_v8 = vld [vmem:[%s6943_s4 + $0x140] sm:$0xf] }
  0x9c   :  { %1300 = vmatpush.bf16.msra.mxu0 %v3297_v15  ;;  %v3725_v18 = vor.u32 %v4483_v9, %v3724_v8  ;;  %v4491_v8 = vld [vmem:[%s6943_s4 + $0x184] sm:$0xf0]  ;;  %v3876_v9 = vld [vmem:[%s6943_s4 + $0x270] sm:$0xf] }
  0x9d   :  { %1314 = vmatpush.bf16.msra.mxu1 %v3361_v19  ;;  %v3588_v19 = vld [vmem:[%s6943_s4 + $0x30] sm:$0xf] }
  0x9e   :  { %1328 = vmatpush.bf16.msra.mxu2 %v3425_v20  ;;  %v4449_v20 = vld [vmem:[%s6943_s4 + $0x34] sm:$0xf0] }
  0x9f   :  { %1342 = vmatpush.bf16.msra.mxu3 %v3489_v24  ;;  %v3716_v24 = vld [vmem:[%s6943_s4 + $0x130] sm:$0xf]  ;;  %v3589_v29 = vor.u32 %v4449_v20, %v3588_v19  ;;  %v3622_v19 = vld [vmem:[%s6943_s4 + $0x78] sm:$0xf0]  ;;  %v4472_v20 = vld [vmem:[%s6943_s4 + $0xf4] sm:$0xf] }
  0xa0   :  { %1301 = vmatpush.bf16.msra.mxu0 %v3289_v17  ;;  %v1079_v13 = vpop.f32.mrf.mxu0  ;;  %v3653_v17 = vor.u32 %v4465_v23, %v3652_v21  ;;  %v3717_v39 = vor.u32 %v4481_v25, %v3716_v24  ;;  %v3686_v21 = vld [vmem:[%s6943_s4 + $0xf8] sm:$0xf0]  ;;  %v3868_v24 = vld [vmem:[%s6943_s4 + $0x260] sm:$0xf]  ;;  %v4519_v25 = vld [vmem:[%s6943_s4 + $0x264] sm:$0xf0] }
  0xa1   :  { %1315 = vmatpush.bf16.msra.mxu1 %v3353_v33  ;;  %v1080_v15 = vadd.f32 %v1079_v13, %v216_v3  ;;  %v1093_v28 = vpop.f32.mrf.mxu1  ;;  %v3644_v33 = vld [vmem:[%s6943_s4 + $0xa0] sm:$0xf]  ;;  %v3940_v13 = vld [vmem:[%s6943_s4 + $0x2f0] sm:$0xf] }
  0xa2   :  { %1329 = vmatpush.bf16.msra.mxu2 %v3417_v34  ;;  %v3781_v34 = vor.u32 %v4497_v26, %v3780_v1  ;;  %v3645_v49 = vor.u32 %v4463_v35, %v3644_v33  ;;  %v3540_v1 = vld [vmem:[%s6945_s1] sm:$0xf]  ;;  %v4279_v26 = vld [vmem:[%s6945_s1 + $0x14] sm:$0xf0] }
  0xa3   :  { %1343 = vmatpush.bf16.msra.mxu3 %v3481_v37  ;;  %1302 = vmatmul.bf16.vlgmr.msra.gmra.mxu0 %v5195_v43  ;;  %v3796_v43 = vld [vmem:[%s6943_s4 + $0x1d0] sm:$0xf]  ;;  %v1094_v30 = vadd.f32 %v1093_v28, %v1080_v15  ;;  %v4479_v37 = vld [vmem:[%s6943_s4 + $0x124] sm:$0xf0]  ;;  %v4456_v15 = vld [vmem:[%s6943_s4 + $0x74] sm:$0xf] }
  0xa4   :  { %1962 = vmatpush.bf16.msrb.mxu0 %v3621_v38  ;;  %1316 = vmatmul.bf16.vlgmr.msra.gmra.mxu1 %v5205_v47  ;;  %v3596_v47 = vld [vmem:[%s6943_s4 + $0x40] sm:$0xf]  ;;  %v3797_v6 = vor.u32 %v4501_v0, %v3796_v43  ;;  %v3709_v50 = vor.u32 %v4479_v37, %v3708_v36  ;;  %v3573_v43 = vor.u32 %v4445_v52, %v3572_v51  ;;  %v4443_v0 = vld [vmem:[%s6943_s4 + $0x4] sm:$0xf0]  ;;  %v4276_v28 = vld [vmem:[%s6945_s1 + $0x4] sm:$0xf] }
  0xa5   :  { %1976 = vmatpush.bf16.msrb.mxu1 %v3685_v40  ;;  %1330 = vmatmul.bf16.vlgmr.msra.gmra.mxu2 %v5400_v27  ;;  %v3733_v27 = vor.u32 %v4485_v63, %v3732_v62  ;;  %v3597_v14 = vor.u32 %v4451_v5, %v3596_v47  ;;  %v3772_v40 = vld [vmem:[%s6943_s4 + $0x1a0] sm:$0xf]  ;;  %v4277_v37 = vld [vmem:[%s6945_s1 + $0xc] sm:$0xf]  ;;  %v6045_v51 = vor.u32 %v4280_v44, %v3548_v32 }
  0xa6   :  { %1990 = vmatpush.bf16.msrb.mxu2 %v3749_v41  ;;  %1344 = vmatmul.bf16.vlgmr.msra.gmra.mxu3 %v5411_v31  ;;  %v3660_v31 = vld [vmem:[%s6943_s4 + $0xc0] sm:$0xf]  ;;  %v4495_v41 = vld [vmem:[%s6943_s4 + $0x1a4] sm:$0xf0]  ;;  %v3869_v52 = vor.u32 %v4519_v25, %v3868_v24  ;;  %v4448_v24 = vld [vmem:[%s6943_s4 + $0x34] sm:$0xf] }
  0xa7   :  { %2004 = vmatpush.bf16.msrb.mxu3 %v3813_v48  ;;  %v3661_v16 = vor.u32 %v4467_v7, %v3660_v31  ;;  %v3692_v5 = vld [vmem:[%s6943_s4 + $0x100] sm:$0xf]  ;;  %v4475_v31 = vld [vmem:[%s6943_s4 + $0x104] sm:$0xf0]  ;;  %v3590_v25 = vld [vmem:[%s6943_s4 + $0x38] sm:$0xf0] }
  0xa8   :  { %1963 = vmatpush.bf16.msrb.mxu0 %v3613_v54  ;;  %v1107_v38 = vpop.f32.mrf.mxu2  ;;  %v1081_v45 = vpop.f32.mrf.mxu0  ;;  %v3773_v54 = vor.u32 %v4495_v41, %v3772_v40  ;;  %v3693_v23 = vor.u32 %v4475_v31, %v3692_v5  ;;  %v3932_v35 = vld [vmem:[%s6943_s4 + $0x2e0] sm:$0xf]  ;;  %v3689_v40 = vor.u32 %v4472_v20, %v3686_v21  ;;  %v4535_v41 = vld [vmem:[%s6943_s4 + $0x2e4] sm:$0xf0]  ;;  %v4513_v20 = vld [vmem:[%s6943_s4 + $0x234] sm:$0xf0] }
  0xa9   :  { %1977 = vmatpush.bf16.msrb.mxu1 %v3677_v55  ;;  %v1108_v42 = vadd.f32 %v1107_v38, %v1094_v30  ;;  %v1082_v48 = vadd.f32 %v1081_v45, %v216_v3  ;;  %v3700_v55 = vld [vmem:[%s6943_s4 + $0x110] sm:$0xf]  ;;  %v1121_v56 = vpop.f32.mrf.mxu3  ;;  %v1095_v63 = vpop.f32.mrf.mxu1  ;;  %v4459_v3 = vld [vmem:[%s6943_s4 + $0x84] sm:$0xf0]  ;;  %v3877_v30 = vor.u32 %v4521_v11, %v3876_v9  ;;  %v3550_v38 = vld [vmem:[%s6945_s1 + $0x20] sm:$0xf0] }
  0xaa   :  { %1991 = vmatpush.bf16.msrb.mxu2 %v3741_v10  ;;  %v4477_v10 = vld [vmem:[%s6943_s4 + $0x114] sm:$0xf0]  ;;  %v3614_v45 = vld [vmem:[%s6943_s4 + $0x68] sm:$0xf0]  ;;  %v3916_v5 = vld [vmem:[%s6943_s4 + $0x2c0] sm:$0xf] }
  0xab   :  { %2005 = vmatpush.bf16.msrb.mxu3 %v3805_v60  ;;  %v4493_v60 = vld [vmem:[%s6943_s4 + $0x194] sm:$0xf0]  ;;  %v5944_v62 = vadd.f32 %v1121_v56, %v1108_v42  ;;  %v3701_v47 = vor.u32 %v4477_v10, %v3700_v55  ;;  %v4454_v42 = vld [vmem:[%s6943_s4 + $0x64] sm:$0xf]  ;;  %v3860_v55 = vld [vmem:[%s6943_s4 + $0x250] sm:$0xf] }
  0xac   :  { %1964 = vmatpush.bf16.msrb.mxu0 %v3605_v2  ;;  %v3628_v2 = vld [vmem:[%s6943_s4 + $0x80] sm:$0xf]  ;;  %v3765_v7 = vor.u32 %v4493_v60, %v3764_v57  ;;  %v4517_v10 = vld [vmem:[%s6943_s4 + $0x254] sm:$0xf0]  ;;  %v3924_v56 = vld [vmem:[%s6943_s4 + $0x2d0] sm:$0xf] }
  0xad   :  { %1978 = vmatpush.bf16.msrb.mxu1 %v3669_v4  ;;  %v1096_v4 = vadd.f32 %v1095_v63, %v1082_v48  ;;  %v4470_v48 = vld [vmem:[%s6943_s4 + $0xe4] sm:$0xf]  ;;  %v4533_v60 = vld [vmem:[%s6943_s4 + $0x2d4] sm:$0xf0]  ;;  %v3606_v63 = vld [vmem:[%s6943_s4 + $0x58] sm:$0xf0] }
  0xae   :  { %1992 = vmatpush.bf16.msrb.mxu2 %v3733_v27  ;;  %v3637_v27 = vor.u32 %v4461_v58, %v3636_v53  ;;  %v6047_v53 = vor.u32 %v4277_v37, %v3550_v38  ;;  %v3617_v58 = vor.u32 %v4454_v42, %v3614_v45  ;;  %v4466_v11 = vld [vmem:[%s6943_s4 + $0xc4] sm:$0xf]  ;;  %v3908_v21 = vld [vmem:[%s6943_s4 + $0x2b0] sm:$0xf]  ;;  %v3900_v32 = vld [vmem:[%s6943_s4 + $0x2a0] sm:$0xf] }
  0xaf   :  { %2006 = vmatpush.bf16.msrb.mxu3 %v3797_v6  ;;  %v3756_v6 = vld [vmem:[%s6943_s4 + $0x180] sm:$0xf]  ;;  %v3582_v37 = vld [vmem:[%s6943_s4 + $0x28] sm:$0xf0]  ;;  %v4462_v42 = vld [vmem:[%s6943_s4 + $0xa4] sm:$0xf] }
  0xb0   :  { %1965 = vmatpush.bf16.msrb.mxu0 %v3597_v14  ;;  %v1109_v12 = vpop.f32.mrf.mxu2  ;;  %v4537_v14 = vld [vmem:[%s6943_s4 + $0x2f4] sm:$0xf0]  ;;  %v3646_v45 = vld [vmem:[%s6943_s4 + $0xa8] sm:$0xf0] }
  0xb1   :  { %1979 = vmatpush.bf16.msrb.mxu1 %v3661_v16  ;;  %v1110_v16 = vadd.f32 %v1109_v12, %v1096_v4  ;;  %v3941_v33 = vor.u32 %v4537_v14, %v3940_v13  ;;  %v3662_v12 = vld [vmem:[%s6943_s4 + $0xc8] sm:$0xf0] }
  0xb2   :  { %1993 = vmatpush.bf16.msrb.mxu2 %v3725_v18  ;;  %v3565_v18 = vor.u32 %v4443_v0, %v3564_v61  ;;  %v4452_v61 = vld [vmem:[%s6943_s4 + $0x54] sm:$0xf]  ;;  %v3670_v0 = vld [vmem:[%s6943_s4 + $0xd8] sm:$0xf0] }
  0xb3   :  { %2007 = vmatpush.bf16.msrb.mxu3 %v3789_v22  ;;  %v3629_v22 = vor.u32 %v4459_v3, %v3628_v2  ;;  %v3861_v2 = vor.u32 %v4517_v10, %v3860_v55  ;;  %v3925_v3 = vor.u32 %v4533_v60, %v3924_v56  ;;  %v3609_v4 = vor.u32 %v4452_v61, %v3606_v63  ;;  %v3828_v10 = vld [vmem:[%s6943_s4 + $0x210] sm:$0xf]  ;;  %v4509_v56 = vld [vmem:[%s6943_s4 + $0x214] sm:$0xf0]  ;;  %v4444_v63 = vld [vmem:[%s6943_s4 + $0x14] sm:$0xf] }
  0xb4   :  { %1966 = vmatpush.bf16.msrb.mxu0 %v3589_v29  ;;  %v3757_v29 = vor.u32 %v4491_v8, %v3756_v6  ;;  %v4531_v6 = vld [vmem:[%s6943_s4 + $0x2c4] sm:$0xf0]  ;;  %v3598_v8 = vld [vmem:[%s6943_s4 + $0x48] sm:$0xf0]  ;;  %v4525_v61 = vld [vmem:[%s6943_s4 + $0x294] sm:$0xf0] }
  0xb5   :  { %1980 = vmatpush.bf16.msrb.mxu1 %v3653_v17  ;;  %v1123_v17 = vpop.f32.mrf.mxu3 }
  0xb6   :  { %1994 = vmatpush.bf16.msrb.mxu2 %v3717_v39  ;;  %v3542_v39 = vld [vmem:[%s6945_s1 + $0x18] sm:$0xf0]  ;;  %v6018_v36 = vadd.f32 %v1123_v17, %v1110_v16  ;;  %v3917_v16 = vor.u32 %v4531_v6, %v3916_v5  ;;  %v3836_v17 = vld [vmem:[%s6943_s4 + $0x220] sm:$0xf]  ;;  %v4523_v6 = vld [vmem:[%s6943_s4 + $0x284] sm:$0xf0] }
  0xb7   :  { %2008 = vmatpush.bf16.msrb.mxu3 %v3781_v34  ;;  %v3625_v34 = vor.u32 %v4456_v15, %v3622_v19  ;;  %v3844_v19 = vld [vmem:[%s6943_s4 + $0x230] sm:$0xf] }
  0xb8   :  { %1967 = vmatpush.bf16.msrb.mxu0 %v3581_v46  ;;  %v6035_v46 = vor.u32 %v4279_v26, %v3540_v1  ;;  %v4464_v1 = vld [vmem:[%s6943_s4 + $0xb4] sm:$0xf]  ;;  %v3654_v26 = vld [vmem:[%s6943_s4 + $0xb8] sm:$0xf0] }
  0xb9   :  { %1981 = vmatpush.bf16.msrb.mxu1 %v3645_v49  ;;  %v3678_v49 = vld [vmem:[%s6943_s4 + $0xe8] sm:$0xf0]  ;;  %v3657_v44 = vor.u32 %v4464_v1, %v3654_v26  ;;  %v3942_v26 = vld [vmem:[%s6943_s4 + $0x2f8] sm:$0xf0] }
  0xba   :  { %1995 = vmatpush.bf16.msrb.mxu2 %v3709_v50  ;;  %v6043_v50 = vor.u32 %v4276_v28, %v3542_v39  ;;  %v3681_v57 = vor.u32 %v4470_v48, %v3678_v49  ;;  %v3845_v28 = vor.u32 %v4513_v20, %v3844_v19  ;;  %v4511_v39 = vld [vmem:[%s6943_s4 + $0x224] sm:$0xf0]  ;;  %v4504_v19 = vld [vmem:[%s6943_s4 + $0x1f4] sm:$0xf]  ;;  %v3814_v20 = vld [vmem:[%s6943_s4 + $0x1f8] sm:$0xf0] }
  0xbb   :  { %2009 = vmatpush.bf16.msrb.mxu3 %v3773_v54  ;;  %v3933_v54 = vor.u32 %v4535_v41, %v3932_v35  ;;  %v4446_v35 = vld [vmem:[%s6943_s4 + $0x24] sm:$0xf]  ;;  %v3837_v49 = vor.u32 %v4511_v39, %v3836_v17  ;;  %v4278_v39 = vld [vmem:[%s6945_s1 + $0x14] sm:$0xf] }
  0xbc   :  { %1968 = vmatpush.bf16.msrb.mxu0 %v3573_v43  ;;  %v4468_v43 = vld [vmem:[%s6943_s4 + $0xd4] sm:$0xf]  ;;  %v3585_v55 = vor.u32 %v4446_v35, %v3582_v37  ;;  %v3742_v35 = vld [vmem:[%s6943_s4 + $0x168] sm:$0xf0]  ;;  %v4502_v37 = vld [vmem:[%s6943_s4 + $0x1e4] sm:$0xf] }
  0xbd   :  { %1982 = vmatpush.bf16.msrb.mxu1 %v3637_v27  ;;  %v3852_v27 = vld [vmem:[%s6943_s4 + $0x240] sm:$0xf]  ;;  %v3673_v31 = vor.u32 %v4468_v43, %v3670_v0  ;;  %v3574_v43 = vld [vmem:[%s6943_s4 + $0x18] sm:$0xf0]  ;;  %v4460_v0 = vld [vmem:[%s6943_s4 + $0x94] sm:$0xf] }
  0xbe   :  { %1996 = vmatpush.bf16.msrb.mxu2 %v3701_v47  ;;  %v4515_v47 = vld [vmem:[%s6943_s4 + $0x244] sm:$0xf0] }
  0xbf   :  { %2010 = vmatpush.bf16.msrb.mxu3 %v3765_v7  ;;  %v4450_v7 = vld [vmem:[%s6943_s4 + $0x44] sm:$0xf]  ;;  %v3853_v14 = vor.u32 %v4515_v47, %v3852_v27  ;;  %v4507_v27 = vld [vmem:[%s6943_s4 + $0x204] sm:$0xf0]  ;;  %v3884_v47 = vld [vmem:[%s6943_s4 + $0x280] sm:$0xf] }
  0xc0   :  { %1969 = vmatpush.bf16.msrb.mxu0 %v3565_v18  ;;  %v1135_v9 = vpop.f32.mrf.mxu0  ;;  %v3601_v18 = vor.u32 %v4450_v7, %v3598_v8  ;;  %v4442_v7 = vld [vmem:[%s6943_s4 + $0x4] sm:$0xf]  ;;  %v3566_v8 = vld [vmem:[%s6943_s4 + $0x8] sm:$0xf0] }
  0xc1   :  { %1983 = vmatpush.bf16.msrb.mxu1 %v3629_v22  ;;  %v1136_v13 = vadd.f32 %v1135_v9, %v5944_v62  ;;  %v1149_v15 = vpop.f32.mrf.mxu1  ;;  %v3665_v62 = vor.u32 %v4466_v11, %v3662_v12  ;;  %v4458_v12 = vld [vmem:[%s6943_s4 + $0x84] sm:$0xf]  ;;  %v3569_v1 = vor.u32 %v4442_v7, %v3566_v8  ;;  %v3854_v7 = vld [vmem:[%s6943_s4 + $0x248] sm:$0xf0] }
  0xc2   :  { %1997 = vmatpush.bf16.msrb.mxu2 %v3693_v23  ;;  %v4529_v23 = vld [vmem:[%s6943_s4 + $0x2b4] sm:$0xf0] }
  0xc3   :  { %2011 = vmatpush.bf16.msrb.mxu3 %v3757_v29  ;;  %1970 = vmatmul.bf16.vlgmr.msrb.gmra.mxu0 %v6035_v46  ;;  %v1150_v22 = vadd.f32 %v1149_v15, %v1136_v13  ;;  %v3909_v29 = vor.u32 %v4529_v23, %v3908_v21  ;;  %v3630_v13 = vld [vmem:[%s6943_s4 + $0x88] sm:$0xf0]  ;;  %v4536_v23 = vld [vmem:[%s6943_s4 + $0x2f4] sm:$0xf] }
  0xc4   :  { %2018 = vmatpush.bf16.msra.mxu0 %v3877_v30  ;;  %1984 = vmatmul.bf16.vlgmr.msrb.gmra.mxu1 %v6043_v50  ;;  %v3593_v30 = vor.u32 %v4448_v24, %v3590_v25  ;;  %v3885_v25 = vor.u32 %v4523_v6, %v3884_v47  ;;  %v3726_v47 = vld [vmem:[%s6943_s4 + $0x148] sm:$0xf0]  ;;  %v4514_v6 = vld [vmem:[%s6943_s4 + $0x244] sm:$0xf] }
  0xc5   :  { %2032 = vmatpush.bf16.msra.mxu1 %v3941_v33  ;;  %1998 = vmatmul.bf16.vlgmr.msrb.gmra.mxu2 %v6045_v51 }
  0xc6   :  { %2046 = vmatpush.bf16.msra.mxu2 %v3625_v34  ;;  %2012 = vmatmul.bf16.vlgmr.msrb.gmra.mxu3 %v6047_v53  ;;  %v4527_v34 = vld [vmem:[%s6943_s4 + $0x2a4] sm:$0xf0] }
  0xc7   :  { %2060 = vmatpush.bf16.msra.mxu3 %v3689_v40 }
  0xc8   :  { %2019 = vmatpush.bf16.msra.mxu0 %v3869_v52  ;;  %v1163_v33 = vpop.f32.mrf.mxu2  ;;  %v1137_v40 = vpop.f32.mrf.mxu0 }
  0xc9   :  { %2033 = vmatpush.bf16.msra.mxu1 %v3933_v54  ;;  %v1164_v38 = vadd.f32 %v1163_v33, %v1150_v22  ;;  %v1177_v41 = vpop.f32.mrf.mxu3  ;;  %v1138_v48 = vadd.f32 %v1137_v40, %v6018_v36  ;;  %v1151_v52 = vpop.f32.mrf.mxu1  ;;  %v3892_v36 = vld [vmem:[%s6943_s4 + $0x290] sm:$0xf]  ;;  %v3878_v22 = vld [vmem:[%s6943_s4 + $0x278] sm:$0xf0] }
  0xca   :  { %2047 = vmatpush.bf16.msra.mxu2 %v3617_v58  ;;  %v3901_v58 = vor.u32 %v4527_v34, %v3900_v32  ;;  %v3893_v5 = vor.u32 %v4525_v61, %v3892_v36  ;;  %v3558_v32 = vld [vmem:[%s6945_s1 + $0x28] sm:$0xf0]  ;;  %v4486_v34 = vld [vmem:[%s6943_s4 + $0x164] sm:$0xf]  ;;  %v3734_v36 = vld [vmem:[%s6943_s4 + $0x158] sm:$0xf0] }
  0xcb   :  { %2061 = vmatpush.bf16.msra.mxu3 %v3681_v57  ;;  %v6151_v54 = vadd.f32 %v1177_v41, %v1164_v38  ;;  %v3649_v57 = vor.u32 %v4462_v42, %v3646_v45  ;;  %v1152_v60 = vadd.f32 %v1151_v52, %v1138_v48  ;;  %v3945_v38 = vor.u32 %v4536_v23, %v3942_v26  ;;  %v3806_v41 = vld [vmem:[%s6943_s4 + $0x1e8] sm:$0xf0]  ;;  %v4518_v42 = vld [vmem:[%s6943_s4 + $0x264] sm:$0xf]  ;;  %v3798_v61 = vld [vmem:[%s6943_s4 + $0x1d8] sm:$0xf0] }
  0xcc   :  { %2020 = vmatpush.bf16.msra.mxu0 %v3861_v2  ;;  %v3638_v2 = vld [vmem:[%s6943_s4 + $0x98] sm:$0xf0]  ;;  %v3870_v45 = vld [vmem:[%s6943_s4 + $0x268] sm:$0xf0]  ;;  %v6259_v48 = vor.u32 %v4278_v39, %v3558_v32  ;;  %v217_v26 = vperm.slane %v5823_v59, 1 }
  0xcd   :  { %2034 = vmatpush.bf16.msra.mxu1 %v3925_v3  ;;  %v3829_v3 = vor.u32 %v4509_v56, %v3828_v10  ;;  %v3641_v9 = vor.u32 %v4460_v0, %v3638_v2  ;;  %v3934_v52 = vld [vmem:[%s6943_s4 + $0x2e8] sm:$0xf0]  ;;  %v3873_v10 = vor.u32 %v4518_v42, %v3870_v45  ;;  %v4484_v56 = vld [vmem:[%s6943_s4 + $0x154] sm:$0xf]  ;;  %v3926_v2 = vld [vmem:[%s6943_s4 + $0x2d8] sm:$0xf0] }
  0xce   :  { %2048 = vmatpush.bf16.msra.mxu2 %v3609_v4  ;;  %v3820_v4 = vld [vmem:[%s6943_s4 + $0x200] sm:$0xf]  ;;  %v4532_v0 = vld [vmem:[%s6943_s4 + $0x2d4] sm:$0xf]  ;;  %v3846_v23 = vld [vmem:[%s6943_s4 + $0x238] sm:$0xf0] }
  0xcf   :  { %2062 = vmatpush.bf16.msra.mxu3 %v3673_v31  ;;  %v3577_v31 = vor.u32 %v4444_v63, %v3574_v43  ;;  %v3821_v21 = vor.u32 %v4507_v27, %v3820_v4  ;;  %v4516_v63 = vld [vmem:[%s6943_s4 + $0x254] sm:$0xf]  ;;  %v3862_v43 = vld [vmem:[%s6943_s4 + $0x258] sm:$0xf0]  ;;  %v3710_v39 = vld [vmem:[%s6943_s4 + $0x128] sm:$0xf0] }
  0xd0   :  { %2021 = vmatpush.bf16.msra.mxu0 %v3853_v14  ;;  %v1165_v11 = vpop.f32.mrf.mxu2  ;;  %v4488_v14 = vld [vmem:[%s6943_s4 + $0x174] sm:$0xf]  ;;  %v3865_v27 = vor.u32 %v4516_v63, %v3862_v43  ;;  %v4494_v32 = vld [vmem:[%s6943_s4 + $0x1a4] sm:$0xf]  ;;  %v3766_v63 = vld [vmem:[%s6943_s4 + $0x198] sm:$0xf0] }
  0xd1   :  { %2035 = vmatpush.bf16.msra.mxu1 %v3917_v16  ;;  %v1166_v15 = vadd.f32 %v1165_v11, %v1152_v60  ;;  %v1179_v16 = vpop.f32.mrf.mxu3  ;;  %v3918_v11 = vld [vmem:[%s6943_s4 + $0x2c8] sm:$0xf0]  ;;  %v4508_v43 = vld [vmem:[%s6943_s4 + $0x214] sm:$0xf] }
  0xd2   :  { %2049 = vmatpush.bf16.msra.mxu2 %v3601_v18  ;;  %v3750_v18 = vld [vmem:[%s6943_s4 + $0x178] sm:$0xf0] }
  0xd3   :  { %2063 = vmatpush.bf16.msra.mxu3 %v3665_v62  ;;  %v4520_v62 = vld [vmem:[%s6943_s4 + $0x274] sm:$0xf]  ;;  %v6222_v24 = vadd.f32 %v1179_v16, %v1166_v15  ;;  %v3753_v17 = vor.u32 %v4488_v14, %v3750_v18  ;;  %v3857_v16 = vor.u32 %v4514_v6, %v3854_v7  ;;  %v3758_v7 = vld [vmem:[%s6943_s4 + $0x188] sm:$0xf0] }
  0xd4   :  { %2022 = vmatpush.bf16.msra.mxu0 %v3845_v28  ;;  %v3556_v28 = vld [vmem:[%s6945_s1 + $0x10] sm:$0xf]  ;;  %v3881_v33 = vor.u32 %v4520_v62, %v3878_v22  ;;  %v4480_v18 = vld [vmem:[%s6943_s4 + $0x134] sm:$0xf]  ;;  %v3782_v62 = vld [vmem:[%s6943_s4 + $0x1b8] sm:$0xf0] }
  0xd5   :  { %2036 = vmatpush.bf16.msra.mxu1 %v3909_v29  ;;  %v4281_v29 = vld [vmem:[%s6945_s1 + $0x24] sm:$0xf0]  ;;  %v4512_v22 = vld [vmem:[%s6943_s4 + $0x234] sm:$0xf] }
  0xd6   :  { %2050 = vmatpush.bf16.msra.mxu2 %v3593_v30  ;;  %v3633_v30 = vor.u32 %v4458_v12, %v3630_v13  ;;  %v6248_v40 = vor.u32 %v4281_v29, %v3556_v28 }
  0xd7   :  { %2064 = vmatpush.bf16.msra.mxu3 %v3657_v44  ;;  %v3817_v44 = vor.u32 %v4504_v19, %v3814_v20  ;;  %v3718_v19 = vld [vmem:[%s6943_s4 + $0x138] sm:$0xf0]  ;;  %v4496_v20 = vld [vmem:[%s6943_s4 + $0x1b4] sm:$0xf] }
  0xd8   :  { %2023 = vmatpush.bf16.msra.mxu0 %v3837_v49  ;;  %v4534_v49 = vld [vmem:[%s6943_s4 + $0x2e4] sm:$0xf]  ;;  %v3721_v28 = vor.u32 %v4480_v18, %v3718_v19  ;;  %v3785_v29 = vor.u32 %v4496_v20, %v3782_v62 }
  0xd9   :  { %2037 = vmatpush.bf16.msra.mxu1 %v3901_v58  ;;  %v3745_v58 = vor.u32 %v4486_v34, %v3742_v35  ;;  %v3937_v60 = vor.u32 %v4534_v49, %v3934_v52  ;;  %v3838_v34 = vld [vmem:[%s6943_s4 + $0x228] sm:$0xf0] }
  0xda   :  { %2051 = vmatpush.bf16.msra.mxu2 %v3585_v55  ;;  %v3809_v55 = vor.u32 %v4502_v37, %v3806_v41  ;;  %v3902_v41 = vld [vmem:[%s6943_s4 + $0x2a8] sm:$0xf0] }
  0xdb   :  { %2065 = vmatpush.bf16.msra.mxu3 %v3649_v57  ;;  %v4500_v57 = vld [vmem:[%s6943_s4 + $0x1d4] sm:$0xf] }
  0xdc   :  { %2024 = vmatpush.bf16.msra.mxu0 %v3829_v3  ;;  %v3737_v3 = vor.u32 %v4484_v56, %v3734_v36  ;;  %v3801_v4 = vor.u32 %v4500_v57, %v3798_v61  ;;  %v4476_v56 = vld [vmem:[%s6943_s4 + $0x114] sm:$0xf]  ;;  %v3702_v36 = vld [vmem:[%s6943_s4 + $0x118] sm:$0xf0] }
  0xdd   :  { %2038 = vmatpush.bf16.msra.mxu1 %v3893_v5  ;;  %v4498_v5 = vld [vmem:[%s6943_s4 + $0x1c4] sm:$0xf]  ;;  %v4492_v57 = vld [vmem:[%s6943_s4 + $0x194] sm:$0xf] }
  0xde   :  { %2052 = vmatpush.bf16.msra.mxu2 %v3577_v31  ;;  %v3929_v31 = vor.u32 %v4532_v0, %v3926_v2  ;;  %v3830_v0 = vld [vmem:[%s6943_s4 + $0x218] sm:$0xf0]  ;;  %v4524_v2 = vld [vmem:[%s6943_s4 + $0x294] sm:$0xf] }
  0xdf   :  { %2066 = vmatpush.bf16.msra.mxu3 %v3641_v9  ;;  %v4530_v9 = vld [vmem:[%s6943_s4 + $0x2c4] sm:$0xf] }
  0xe0   :  { %2025 = vmatpush.bf16.msra.mxu0 %v3821_v21  ;;  %v1191_v8 = vpop.f32.mrf.mxu0 }
  0xe1   :  { %2039 = vmatpush.bf16.msra.mxu1 %v3885_v25  ;;  %v1192_v12 = vadd.f32 %v1191_v8, %v6151_v54  ;;  %v1205_v14 = vpop.f32.mrf.mxu1  ;;  %v3921_v54 = vor.u32 %v4530_v9, %v3918_v11  ;;  %v4528_v25 = vld [vmem:[%s6943_s4 + $0x2b4] sm:$0xf]  ;;  %v4506_v8 = vld [vmem:[%s6943_s4 + $0x204] sm:$0xf]  ;;  %v3822_v9 = vld [vmem:[%s6943_s4 + $0x208] sm:$0xf0] }
  0xe2   :  { %2053 = vmatpush.bf16.msra.mxu2 %v3569_v1  ;;  %v3910_v1 = vld [vmem:[%s6943_s4 + $0x2b8] sm:$0xf0]  ;;  %v3825_v19 = vor.u32 %v4506_v8, %v3822_v9  ;;  %v3964_v9 = vld [vmem:[%s6946_s7 + $0x20] sm:$0xf] }
  0xe3   :  { %2067 = vmatpush.bf16.msra.mxu3 %v3633_v30  ;;  %2026 = vmatmul.bf16.vlgmr.msra.gmra.mxu0 %v6248_v40  ;;  %v6329_v21 = vadd.f32 %v1205_v14, %v1192_v12  ;;  %v3849_v30 = vor.u32 %v4512_v22, %v3846_v23  ;;  %v3913_v59 = vor.u32 %v4528_v25, %v3910_v1  ;;  %v4522_v12 = vld [vmem:[%s6943_s4 + $0x284] sm:$0xf] }
  0xe4   :  { %2074 = vmatpush.bf16.msrb.mxu0 %v3753_v17  ;;  %2040 = vmatmul.bf16.vlgmr.msra.gmra.mxu1 %v6259_v48  ;;  %v4478_v17 = vld [vmem:[%s6943_s4 + $0x124] sm:$0xf] }
  0xe5   :  { %2088 = vmatpush.bf16.msrb.mxu1 %v3817_v44  ;;  %2054 = vmatmul.bf16.vlgmr.msra.gmra.mxu2 %v6035_v46  ;;  %v4482_v46 = vld [vmem:[%s6943_s4 + $0x144] sm:$0xf]  ;;  %v3774_v44 = vld [vmem:[%s6943_s4 + $0x1a8] sm:$0xf0]  ;;  %v3713_v52 = vor.u32 %v4478_v17, %v3710_v39  ;;  %4619 = vtanh.f32 %v6329_v21 }
  0xe6   :  { %2102 = vmatpush.bf16.msrb.mxu2 %v3881_v33  ;;  %2068 = vmatmul.bf16.vlgmr.msra.gmra.mxu3 %v6043_v50  ;;  %v3790_v50 = vld [vmem:[%s6943_s4 + $0x1c8] sm:$0xf0]  ;;  %v3729_v13 = vor.u32 %v4482_v46, %v3726_v47  ;;  %v4510_v33 = vld [vmem:[%s6943_s4 + $0x224] sm:$0xf]  ;;  %v3769_v46 = vor.u32 %v4492_v57, %v3766_v63  ;;  %v3833_v47 = vor.u32 %v4508_v43, %v3830_v0 }
  0xe7   :  { %2116 = vmatpush.bf16.msrb.mxu3 %v3945_v38  ;;  %v3793_v15 = vor.u32 %v4498_v5, %v3790_v50  ;;  %v4526_v38 = vld [vmem:[%s6943_s4 + $0x2a4] sm:$0xf]  ;;  %v3982_v43 = vld [vmem:[%s6946_s7 + $0x48] sm:$0xf0] }
  0xe8   :  { %2075 = vmatpush.bf16.msrb.mxu0 %v3745_v58  ;;  %v1219_v35 = vpop.f32.mrf.mxu2  ;;  %v1193_v37 = vpop.f32.mrf.mxu0  ;;  %v4474_v5 = vld [vmem:[%s6943_s4 + $0x104] sm:$0xf] }
  0xe9   :  { %2089 = vmatpush.bf16.msrb.mxu1 %v3809_v55  ;;  %v1220_v42 = vadd.f32 %v1219_v35, %v217_v26  ;;  %v1233_v45 = vpop.f32.mrf.mxu3  ;;  %v1194_v49 = vadd.f32 %v1193_v37, %v6222_v24  ;;  %v1207_v58 = vpop.f32.mrf.mxu1  ;;  %v3777_v55 = vor.u32 %v4494_v32, %v3774_v44  ;;  %v3905_v24 = vor.u32 %v4526_v38, %v3902_v41  ;;  %v4490_v50 = vld [vmem:[%s6943_s4 + $0x184] sm:$0xf]  ;;  %v4006_v35 = vld [vmem:[%s6946_s7 + $0x78] sm:$0xf0]  ;;  %v3996_v37 = vld [vmem:[%s6946_s7 + $0x60] sm:$0xf] }
  0xea   :  { %2103 = vmatpush.bf16.msrb.mxu2 %v3873_v10  ;;  %v3841_v10 = vor.u32 %v4510_v33, %v3838_v34  ;;  %v3761_v18 = vor.u32 %v4490_v50, %v3758_v7  ;;  %v4584_v33 = vld [vmem:[%s6946_s7 + $0x74] sm:$0xf]  ;;  %v4583_v38 = vld [vmem:[%s6946_s7 + $0x64] sm:$0xf0]  ;;  %v4578_v63 = vld [vmem:[%s6946_s7 + $0x44] sm:$0xf] }
  0xeb   :  { %2117 = vmatpush.bf16.msrb.mxu3 %v3937_v60  ;;  %v1234_v60 = vadd.f32 %v1233_v45, %v1220_v42  ;;  %v6381_v61 = vadd.f32 %v1207_v58, %v1194_v49  ;;  %v4009_v41 = vor.u32 %v4584_v33, %v4006_v35  ;;  %v4582_v42 = vld [vmem:[%s6946_s7 + $0x64] sm:$0xf]  ;;  %v3998_v45 = vld [vmem:[%s6946_s7 + $0x68] sm:$0xf0]  ;;  %v3997_v49 = vor.u32 %v4583_v38, %v3996_v37  ;;  %v3988_v58 = vld [vmem:[%s6946_s7 + $0x50] sm:$0xf] }
  0xec   :  { %2076 = vmatpush.bf16.msrb.mxu0 %v3737_v3  ;;  %v3894_v3 = vld [vmem:[%s6943_s4 + $0x298] sm:$0xf0]  ;;  %v4132_v35 = vld [vmem:[%s6947_s6 + $0x70] sm:$0xf]  ;;  %v4553_v37 = vld [vmem:[%s6947_s6 + $0x74] sm:$0xf0] }
  0xed   :  { %2090 = vmatpush.bf16.msrb.mxu1 %v3801_v4  ;;  %v6400_v4 = vpack.c.bf16 %v6381_v61, %v6329_v21  ;;  %v3897_v6 = vor.u32 %v4524_v2, %v3894_v3  ;;  %v3985_v3 = vor.u32 %v4578_v63, %v3982_v43  ;;  %v3974_v50 = vld [vmem:[%s6946_s7 + $0x38] sm:$0xf0]  ;;  %v4552_v38 = vld [vmem:[%s6947_s6 + $0x74] sm:$0xf] }
  0xee   :  { %2104 = vmatpush.bf16.msrb.mxu2 %v3865_v27  ;;  %v3705_v27 = vor.u32 %v4476_v56, %v3702_v36  ;;  %v3990_v56 = vld [vmem:[%s6946_s7 + $0x58] sm:$0xf0] }
  0xef   :  { %2118 = vmatpush.bf16.msrb.mxu3 %v3929_v31  ;;  %v3694_v31 = vld [vmem:[%s6943_s4 + $0x108] sm:$0xf0]  ;;  %v4070_v63 = vld [vmem:[%s6946_s7 + $0xf8] sm:$0xf0] }
  0xf0   :  { %2077 = vmatpush.bf16.msrb.mxu0 %v3729_v13  ;;  %v1221_v11 = vpop.f32.mrf.mxu2  ;;  %v3886_v13 = vld [vmem:[%s6943_s4 + $0x288] sm:$0xf0] }
  0xf1   :  { %2091 = vmatpush.bf16.msrb.mxu1 %v3793_v15  ;;  %v1222_v14 = vadd.f32 %v1221_v11, %v217_v26  ;;  %v3697_v15 = vor.u32 %v4474_v5, %v3694_v31  ;;  %v4577_v5 = vld [vmem:[%s6946_s7 + $0x34] sm:$0xf0]  ;;  %v4576_v31 = vld [vmem:[%s6946_s7 + $0x34] sm:$0xf]  ;;  %v4575_v11 = vld [vmem:[%s6946_s7 + $0x24] sm:$0xf0] }
  0xf2   :  { %2105 = vmatpush.bf16.msrb.mxu2 %v3857_v16  ;;  %v1235_v16 = vpop.f32.mrf.mxu3  ;;  %v3977_v8 = vor.u32 %v4576_v31, %v3974_v50  ;;  %v4060_v31 = vld [vmem:[%s6946_s7 + $0xe0] sm:$0xf]  ;;  %v4599_v50 = vld [vmem:[%s6946_s7 + $0xe4] sm:$0xf0] }
  0xf3   :  { %2119 = vmatpush.bf16.msrb.mxu3 %v3921_v54  ;;  %v1236_v20 = vadd.f32 %v1235_v16, %v1222_v14  ;;  %v3889_v54 = vor.u32 %v4522_v12, %v3886_v13  ;;  %v4574_v12 = vld [vmem:[%s6946_s7 + $0x24] sm:$0xf]  ;;  %v3966_v13 = vld [vmem:[%s6946_s7 + $0x28] sm:$0xf0] }
  0xf4   :  { %2078 = vmatpush.bf16.msrb.mxu0 %v3721_v28 }
  0xf5   :  { %2092 = vmatpush.bf16.msrb.mxu1 %v3785_v29 }
  0xf6   :  { %2106 = vmatpush.bf16.msrb.mxu2 %v3849_v30 }
  0xf7   :  { %2120 = vmatpush.bf16.msrb.mxu3 %v3913_v59 }
  0xf8   :  { %2079 = vmatpush.bf16.msrb.mxu0 %v3713_v52  ;;  %v4001_v52 = vor.u32 %v4582_v42, %v3998_v45  ;;  %v4134_v42 = vld [vmem:[%s6947_s6 + $0x78] sm:$0xf0] }
  0xf9   :  { %2093 = vmatpush.bf16.msrb.mxu1 %v3777_v55  ;;  %v4581_v55 = vld [vmem:[%s6946_s7 + $0x54] sm:$0xf0]  ;;  %v4137_v45 = vor.u32 %v4552_v38, %v4134_v42  ;;  %v4543_v38 = vld [vmem:[%s6947_s6 + $0x24] sm:$0xf0] }
  0xfa   :  { %2107 = vmatpush.bf16.msrb.mxu2 %v3841_v10  ;;  %v4580_v10 = vld [vmem:[%s6946_s7 + $0x54] sm:$0xf]  ;;  %v3989_v36 = vor.u32 %v4581_v55, %v3988_v58  ;;  %v4550_v58 = vld [vmem:[%s6947_s6 + $0x64] sm:$0xf] }
  0xfb   :  { %2121 = vmatpush.bf16.msrb.mxu3 %v3905_v24  ;;  %v3993_v57 = vor.u32 %v4580_v10, %v3990_v56  ;;  %v4579_v24 = vld [vmem:[%s6946_s7 + $0x44] sm:$0xf0]  ;;  %v4126_v10 = vld [vmem:[%s6947_s6 + $0x68] sm:$0xf0] }
  0xfc   :  { %2080 = vmatpush.bf16.msrb.mxu0 %v3705_v27  ;;  %v4129_v56 = vor.u32 %v4550_v58, %v4126_v10  ;;  %v4593_v10 = vld [vmem:[%s6946_s7 + $0xb4] sm:$0xf0] }
  0xfd   :  { %2094 = vmatpush.bf16.msrb.mxu1 %v3769_v46 }
  0xfe   :  { %2108 = vmatpush.bf16.msrb.mxu2 %v3833_v47  ;;  %v3972_v47 = vld [vmem:[%s6946_s7 + $0x30] sm:$0xf] }
  0xff   :  { %2122 = vmatpush.bf16.msrb.mxu3 %v3897_v6  ;;  %v3973_v7 = vor.u32 %v4577_v5, %v3972_v47  ;;  %v4118_v47 = vld [vmem:[%s6947_s6 + $0x58] sm:$0xf0] }
 0x100   :  { %2081 = vmatpush.bf16.msrb.mxu0 %v3697_v15  ;;  %v1247_v62 = vpop.f32.mrf.mxu0  ;;  %v3965_v15 = vor.u32 %v4575_v11, %v3964_v9  ;;  %v4108_v11 = vld [vmem:[%s6947_s6 + $0x40] sm:$0xf] }
 0x101   :  { %2095 = vmatpush.bf16.msrb.mxu1 %v3761_v18  ;;  %v1248_v22 = vadd.f32 %v1247_v62, %v1234_v60  ;;  %v1261_v23 = vpop.f32.mrf.mxu1  ;;  %v3980_v60 = vld [vmem:[%s6946_s7 + $0x40] sm:$0xf] }
 0x102   :  { %2109 = vmatpush.bf16.msrb.mxu2 %v3825_v19  ;;  %v3981_v0 = vor.u32 %v4579_v24, %v3980_v60  ;;  %v4600_v60 = vld [vmem:[%s6946_s7 + $0xf4] sm:$0xf] }
 0x103   :  { %2123 = vmatpush.bf16.msrb.mxu3 %v3889_v54  ;;  %2082 = vmatmul.bf16.vlgmr.msrb.gmra.mxu0 %v6045_v51  ;;  %v1262_v25 = vadd.f32 %v1261_v23, %v1248_v22  ;;  %v3956_v22 = vld [vmem:[%s6946_s7 + $0x10] sm:$0xf]  ;;  %v4573_v23 = vld [vmem:[%s6946_s7 + $0x14] sm:$0xf0]  ;;  %v4073_v43 = vor.u32 %v4600_v60, %v4070_v63 }
 0x104   :  { %2096 = vmatmul.bf16.vlgmr.msrb.gmra.mxu1 %v6047_v53  ;;  %v4084_v63 = vld [vmem:[%s6947_s6 + $0x10] sm:$0xf] }
 0x105   :  { %2110 = vmatmul.bf16.vlgmr.msrb.gmra.mxu2 %v6248_v40  ;;  %v4004_v40 = vld [vmem:[%s6946_s7 + $0x70] sm:$0xf] }
 0x106   :  { %2124 = vmatmul.bf16.vlgmr.msrb.gmra.mxu3 %v6259_v48  ;;  %v4585_v48 = vld [vmem:[%s6946_s7 + $0x74] sm:$0xf0]  ;;  %2394 = vmatpush.bf16.msra.mxu2 %v4009_v41  ;;  %v4133_v41 = vor.u32 %v4553_v37, %v4132_v35  ;;  %v4092_v37 = vld [vmem:[%s6947_s6 + $0x20] sm:$0xf] }
 0x107   :  { %v4005_v34 = vor.u32 %v4585_v48, %v4004_v40  ;;  %2408 = vmatpush.bf16.msra.mxu3 %v4073_v43  ;;  %v4541_v43 = vld [vmem:[%s6947_s6 + $0x14] sm:$0xf0] }
 0x108   :  { %v1275_v1 = vpop.f32.mrf.mxu2  ;;  %v1249_v28 = vpop.f32.mrf.mxu0 }
 0x109   :  { %v1276_v26 = vadd.f32 %v1275_v1, %v1262_v25  ;;  %v1289_v29 = vpop.f32.mrf.mxu3  ;;  %v1250_v30 = vadd.f32 %v1249_v28, %v1236_v20  ;;  %v1263_v17 = vpop.f32.mrf.mxu1  ;;  %2366 = vmatpush.bf16.msra.mxu0 %v4005_v34  ;;  %v3969_v20 = vor.u32 %v4574_v12, %v3966_v13  ;;  %v4572_v25 = vld [vmem:[%s6946_s7 + $0x14] sm:$0xf]  ;;  %v4547_v12 = vld [vmem:[%s6947_s6 + $0x44] sm:$0xf0]  ;;  %v4546_v13 = vld [vmem:[%s6947_s6 + $0x44] sm:$0xf] }
 0x10a   :  { %2395 = vmatpush.bf16.msra.mxu2 %v4001_v52  ;;  %v4551_v52 = vld [vmem:[%s6947_s6 + $0x64] sm:$0xf0] }
 0x10b   :  { %v1290_v39 = vadd.f32 %v1289_v29, %v1276_v26  ;;  %v1264_v32 = vadd.f32 %v1263_v17, %v1250_v30  ;;  %v3958_v26 = vld [vmem:[%s6946_s7 + $0x18] sm:$0xf0]  ;;  %v3957_v29 = vor.u32 %v4573_v23, %v3956_v22  ;;  %v3948_v17 = vld [vmem:[%s6946_s7] sm:$0xf]  ;;  %v4596_v22 = vld [vmem:[%s6946_s7 + $0xd4] sm:$0xf] }
 0x10c   :  { %v3961_v30 = vor.u32 %v4572_v25, %v3958_v26  ;;  %v4054_v25 = vld [vmem:[%s6946_s7 + $0xd8] sm:$0xf0] }
 0x10d   :  { %2367 = vmatpush.bf16.msra.mxu0 %v3997_v49  ;;  %v4124_v49 = vld [vmem:[%s6947_s6 + $0x60] sm:$0xf]  ;;  %v4057_v26 = vor.u32 %v4596_v22, %v4054_v25  ;;  %v4589_v22 = vld [vmem:[%s6946_s7 + $0x94] sm:$0xf0] }
 0x10e   :  { %2396 = vmatpush.bf16.msra.mxu2 %v3993_v57  ;;  %v4125_v55 = vor.u32 %v4551_v52, %v4124_v49  ;;  %v4601_v57 = vld [vmem:[%s6946_s7 + $0xf4] sm:$0xf0]  ;;  %v4094_v49 = vld [vmem:[%s6947_s6 + $0x28] sm:$0xf0]  ;;  %v4036_v52 = vld [vmem:[%s6946_s7 + $0xb0] sm:$0xf] }
 0x10f   :  { %v4037_v60 = vor.u32 %v4593_v10, %v4036_v52  ;;  %v4567_v10 = vld [vmem:[%s6947_s6 + $0xe4] sm:$0xf0] }
 0x110   :  { %v1277_v59 = vpop.f32.mrf.mxu2 }
 0x111   :  { %v1278_v51 = vadd.f32 %v1277_v59, %v1264_v32  ;;  %v1291_v44 = vpop.f32.mrf.mxu3  ;;  %2368 = vmatpush.bf16.msra.mxu0 %v3989_v36  ;;  %v4570_v32 = vld [vmem:[%s6946_s7 + $0x4] sm:$0xf]  ;;  %v3950_v59 = vld [vmem:[%s6946_s7 + $0x8] sm:$0xf0]  ;;  %v4068_v36 = vld [vmem:[%s6946_s7 + $0xf0] sm:$0xf] }
 0x112   :  { %2397 = vmatpush.bf16.msra.mxu2 %v3985_v3  ;;  %v3953_v48 = vor.u32 %v4570_v32, %v3950_v59  ;;  %v4069_v24 = vor.u32 %v4601_v57, %v4068_v36  ;;  %v4548_v3 = vld [vmem:[%s6947_s6 + $0x54] sm:$0xf]  ;;  %v4038_v36 = vld [vmem:[%s6946_s7 + $0xb8] sm:$0xf0] }
 0x113   :  { %v1292_v53 = vadd.f32 %v1291_v44, %v1278_v51  ;;  %v4121_v5 = vor.u32 %v4548_v3, %v4118_v47  ;;  %v4085_v3 = vor.u32 %v4541_v43, %v4084_v63  ;;  %v4028_v47 = vld [vmem:[%s6946_s7 + $0xa0] sm:$0xf]  ;;  %v6761_v43 = vpop.eup %4619 }
 0x114   :  { %2380 = vmatpush.bf16.msra.mxu1 %v4069_v24 }
 0x115   :  { %2369 = vmatpush.bf16.msra.mxu0 %v3981_v0  ;;  %v4116_v0 = vld [vmem:[%s6947_s6 + $0x50] sm:$0xf] }
 0x116   :  { %2398 = vmatpush.bf16.msra.mxu2 %v3977_v8  ;;  %v4062_v8 = vld [vmem:[%s6946_s7 + $0xe8] sm:$0xf0] }
 0x119   :  { %2370 = vmatpush.bf16.msra.mxu0 %v3973_v7  ;;  %v4061_v7 = vor.u32 %v4599_v50, %v4060_v31 }
 0x11a   :  { %2399 = vmatpush.bf16.msra.mxu2 %v3969_v20 }
 0x11b   :  { %2381 = vmatpush.bf16.msra.mxu1 %v4061_v7  ;;  %v4590_v7 = vld [vmem:[%s6946_s7 + $0xa4] sm:$0xf] }
 0x11d   :  { %2371 = vmatpush.bf16.msra.mxu0 %v3965_v15 }
 0x11e   :  { %2400 = vmatpush.bf16.msra.mxu2 %v3961_v30  ;;  %v4544_v30 = vld [vmem:[%s6947_s6 + $0x34] sm:$0xf] }
 0x120   :  { %v1303_v2 = vpop.f32.mrf.mxu0 }
 0x121   :  { %v1304_v27 = vadd.f32 %v1303_v2, %v1290_v39  ;;  %v1317_v46 = vpop.f32.mrf.mxu1  ;;  %v4571_v39 = vld [vmem:[%s6946_s7 + $0x4] sm:$0xf0]  ;;  %2372 = vmatpush.bf16.msra.mxu0 %v3957_v29  ;;  %v4549_v2 = vld [vmem:[%s6947_s6 + $0x54] sm:$0xf0] }
 0x122   :  { %v3949_v44 = vor.u32 %v4571_v39, %v3948_v17  ;;  %2401 = vmatpush.bf16.msra.mxu2 %v3953_v48  ;;  %v4545_v29 = vld [vmem:[%s6947_s6 + $0x34] sm:$0xf0]  ;;  %v4102_v39 = vld [vmem:[%s6947_s6 + $0x38] sm:$0xf0]  ;;  %v4046_v48 = vld [vmem:[%s6946_s7 + $0xc8] sm:$0xf0] }
 0x123   :  { %v1318_v6 = vadd.f32 %v1317_v46, %v1304_v27  ;;  %v6582_v27 = vld [vmem:[%s6948_s5] sm:$0x3]  ;;  %v4117_v46 = vor.u32 %v4549_v2, %v4116_v0  ;;  %v4105_v59 = vor.u32 %v4544_v30, %v4102_v39  ;;  %v4540_v0 = vld [vmem:[%s6947_s6 + $0x14] sm:$0xf]  ;;  %v4587_v39 = vld [vmem:[%s6946_s7 + $0x84] sm:$0xf0] }
 0x125   :  { %2373 = vmatpush.bf16.msra.mxu0 %v3949_v44  ;;  %v4595_v44 = vld [vmem:[%s6946_s7 + $0xc4] sm:$0xf0] }
 0x126   :  { %2610 = vmatpush.bf16.msrb.mxu2 %v4137_v45  ;;  %v4093_v45 = vor.u32 %v4543_v38, %v4092_v37  ;;  %v4196_v37 = vld [vmem:[%s6947_s6 + $0xf0] sm:$0xf]  ;;  %v4569_v38 = vld [vmem:[%s6947_s6 + $0xf4] sm:$0xf0] }
 0x128   :  { %v1331_v14 = vpop.f32.mrf.mxu2  ;;  %v1305_v18 = vpop.f32.mrf.mxu0 }
 0x129   :  { %v1332_v16 = vadd.f32 %v1331_v14, %v1318_v6  ;;  %v1345_v19 = vpop.f32.mrf.mxu3  ;;  %v1306_v54 = vadd.f32 %v1305_v18, %v1292_v53  ;;  %v1319_v62 = vpop.f32.mrf.mxu1  ;;  %2582 = vmatpush.bf16.msrb.mxu0 %v4133_v41  ;;  %v4598_v6 = vld [vmem:[%s6946_s7 + $0xe4] sm:$0xf]  ;;  %v1448_v14 = vperm.slane %v6582_v27, 0  ;;  %v4110_v18 = vld [vmem:[%s6947_s6 + $0x48] sm:$0xf0] }
 0x12a   :  { %2611 = vmatpush.bf16.msrb.mxu2 %v4129_v56  ;;  %v4065_v9 = vor.u32 %v4598_v6, %v4062_v8  ;;  %v4113_v20 = vor.u32 %v4546_v13, %v4110_v18  ;;  %v4542_v41 = vld [vmem:[%s6947_s6 + $0x24] sm:$0xf]  ;;  %v4592_v56 = vld [vmem:[%s6946_s7 + $0xb4] sm:$0xf]  ;;  %v4030_v8 = vld [vmem:[%s6946_s7 + $0xa8] sm:$0xf0] }
 0x12b   :  { %v6511_v1 = vadd.f32 %v1345_v19, %v1332_v16  ;;  %v1320_v28 = vadd.f32 %v1319_v62, %v1306_v54  ;;  %v4109_v16 = vor.u32 %v4547_v12, %v4108_v11  ;;  %v4052_v54 = vld [vmem:[%s6946_s7 + $0xd0] sm:$0xf]  ;;  %v4597_v62 = vld [vmem:[%s6946_s7 + $0xd4] sm:$0xf0]  ;;  %v4041_v24 = vor.u32 %v4592_v56, %v4038_v36  ;;  %v4078_v18 = vld [vmem:[%s6947_s6 + $0x8] sm:$0xf0] }
 0x12c   :  { %2409 = vmatpush.bf16.msra.mxu3 %v4065_v9  ;;  %v4053_v23 = vor.u32 %v4597_v62, %v4052_v54  ;;  %v4076_v9 = vld [vmem:[%s6947_s6] sm:$0xf]  ;;  %v4033_v13 = vor.u32 %v4590_v7, %v4030_v8  ;;  %v4020_v62 = vld [vmem:[%s6946_s7 + $0x90] sm:$0xf]  ;;  %v4566_v56 = vld [vmem:[%s6947_s6 + $0xe4] sm:$0xf] }
 0x12d   :  { %2583 = vmatpush.bf16.msrb.mxu0 %v4125_v55  ;;  %v4097_v55 = vor.u32 %v4542_v41, %v4094_v49  ;;  %v4568_v41 = vld [vmem:[%s6947_s6 + $0xf4] sm:$0xf]  ;;  %v4198_v49 = vld [vmem:[%s6947_s6 + $0xf8] sm:$0xf0]  ;;  %v4190_v36 = vld [vmem:[%s6947_s6 + $0xe8] sm:$0xf0] }
 0x12e   :  { %2612 = vmatpush.bf16.msrb.mxu2 %v4121_v5  ;;  %2382 = vmatpush.bf16.msra.mxu1 %v4053_v23  ;;  %v4591_v5 = vld [vmem:[%s6946_s7 + $0xa4] sm:$0xf0]  ;;  %v4588_v23 = vld [vmem:[%s6946_s7 + $0x94] sm:$0xf]  ;;  %v4201_v52 = vor.u32 %v4568_v41, %v4198_v49  ;;  %v4172_v8 = vld [vmem:[%s6947_s6 + $0xc0] sm:$0xf] }
 0x12f   :  { %v4029_v6 = vor.u32 %v4591_v5, %v4028_v47  ;;  %v4142_v41 = vld [vmem:[%s6947_s6 + $0x88] sm:$0xf0] }
 0x130   :  { %v1333_v51 = vpop.f32.mrf.mxu2  ;;  %2410 = vmatpush.bf16.msra.mxu3 %v4057_v26  ;;  %v4021_v26 = vor.u32 %v4589_v22, %v4020_v62  ;;  %v4166_v22 = vld [vmem:[%s6947_s6 + $0xb8] sm:$0xf0] }
 0x131   :  { %v1334_v53 = vadd.f32 %v1333_v51, %v1320_v28  ;;  %v1347_v40 = vpop.f32.mrf.mxu3  ;;  %2584 = vmatpush.bf16.msrb.mxu0 %v4117_v46  ;;  %v4100_v28 = vld [vmem:[%s6947_s6 + $0x30] sm:$0xf]  ;;  %v4044_v51 = vld [vmem:[%s6946_s7 + $0xc0] sm:$0xf]  ;;  %v4086_v46 = vld [vmem:[%s6947_s6 + $0x18] sm:$0xf0] }
 0x132   :  { %2613 = vmatpush.bf16.msrb.mxu2 %v4113_v20  ;;  %v4101_v17 = vor.u32 %v4545_v29, %v4100_v28  ;;  %v4089_v50 = vor.u32 %v4540_v0, %v4086_v46  ;;  %v4022_v28 = vld [vmem:[%s6946_s7 + $0x98] sm:$0xf0]  ;;  %v4180_v0 = vld [vmem:[%s6947_s6 + $0xd0] sm:$0xf] }
 0x133   :  { %v6528_v33 = vadd.f32 %v1347_v40, %v1334_v53  ;;  %v4594_v53 = vld [vmem:[%s6946_s7 + $0xc4] sm:$0xf]  ;;  %v4045_v40 = vor.u32 %v4595_v44, %v4044_v51  ;;  %v4025_v29 = vor.u32 %v4588_v23, %v4022_v28  ;;  %v4156_v28 = vld [vmem:[%s6947_s6 + $0xa0] sm:$0xf] }
 0x134   :  { %v4049_v35 = vor.u32 %v4594_v53, %v4046_v48 }
 0x135   :  { %v6532_v34 = vpack.c.bf16 %v6528_v33, %v6511_v1  ;;  %2585 = vmatpush.bf16.msrb.mxu0 %v4109_v16  ;;  %2383 = vmatpush.bf16.msra.mxu1 %v4045_v40  ;;  %v4538_v16 = vld [vmem:[%s6947_s6 + $0x4] sm:$0xf]  ;;  %v4014_v40 = vld [vmem:[%s6946_s7 + $0x88] sm:$0xf0] }
 0x136   :  { %2614 = vmatpush.bf16.msrb.mxu2 %v4105_v59  ;;  %2411 = vmatpush.bf16.msra.mxu3 %v4049_v35  ;;  %v4081_v20 = vor.u32 %v4538_v16, %v4078_v18  ;;  %v4164_v18 = vld [vmem:[%s6947_s6 + $0xb0] sm:$0xf] }
 0x139   :  { %2586 = vmatpush.bf16.msrb.mxu0 %v4101_v17  ;;  %2384 = vmatpush.bf16.msra.mxu1 %v4037_v60  ;;  %v4012_v17 = vld [vmem:[%s6946_s7 + $0x80] sm:$0xf]  ;;  %v4193_v60 = vor.u32 %v4566_v56, %v4190_v36 }
 0x13a   :  { %2615 = vmatpush.bf16.msrb.mxu2 %v4097_v55  ;;  %2412 = vmatpush.bf16.msra.mxu3 %v4041_v24  ;;  %v4013_v53 = vor.u32 %v4587_v39, %v4012_v17  ;;  %v4188_v55 = vld [vmem:[%s6947_s6 + $0xe0] sm:$0xf]  ;;  %v4158_v39 = vld [vmem:[%s6947_s6 + $0xa8] sm:$0xf0] }
 0x13b   :  { %v4189_v21 = vor.u32 %v4567_v10, %v4188_v55 }
 0x13d   :  { %2587 = vmatpush.bf16.msrb.mxu0 %v4093_v45  ;;  %2385 = vmatpush.bf16.msra.mxu1 %v4029_v6  ;;  %v4197_v45 = vor.u32 %v4569_v38, %v4196_v37  ;;  %v4555_v37 = vld [vmem:[%s6947_s6 + $0x84] sm:$0xf0]  ;;  %v4554_v38 = vld [vmem:[%s6947_s6 + $0x84] sm:$0xf] }
 0x13e   :  { %2616 = vmatpush.bf16.msrb.mxu2 %v4089_v50  ;;  %2413 = vmatpush.bf16.msra.mxu3 %v4033_v13  ;;  %v4145_v55 = vor.u32 %v4554_v38, %v4142_v41 }
 0x140   :  { %v1971_v15 = vpop.f32.mrf.mxu0 }
 0x141   :  { %v1985_v19 = vpop.f32.mrf.mxu1  ;;  %v1972_v32 = vadd.f32 %v1971_v15, %v1448_v14  ;;  %v4539_v15 = vld [vmem:[%s6947_s6 + $0x4] sm:$0xf0]  ;;  %2588 = vmatpush.bf16.msrb.mxu0 %v4085_v3  ;;  %2386 = vmatpush.bf16.msra.mxu1 %v4021_v26  ;;  %v4564_v3 = vld [vmem:[%s6947_s6 + $0xd4] sm:$0xf]  ;;  %v1449_v26 = vperm.slane %v6582_v27, 1 }
 0x142   :  { %2617 = vmatpush.bf16.msrb.mxu2 %v4081_v20  ;;  %2414 = vmatpush.bf16.msra.mxu3 %v4025_v29  ;;  %v4560_v20 = vld [vmem:[%s6947_s6 + $0xb4] sm:$0xf]  ;;  %v4559_v29 = vld [vmem:[%s6947_s6 + $0xa4] sm:$0xf0] }
 0x143   :  { %v1986_v58 = vadd.f32 %v1985_v19, %v1972_v32  ;;  %v4077_v19 = vor.u32 %v4539_v15, %v4076_v9  ;;  %v4586_v32 = vld [vmem:[%s6946_s7 + $0x84] sm:$0xf]  ;;  %v4563_v9 = vld [vmem:[%s6947_s6 + $0xc4] sm:$0xf0]  ;;  %v4157_v17 = vor.u32 %v4559_v29, %v4156_v28 }
 0x144   :  { %v4017_v35 = vor.u32 %v4586_v32, %v4014_v40  ;;  %v4148_v32 = vld [vmem:[%s6947_s6 + $0x90] sm:$0xf]  ;;  %v4150_v40 = vld [vmem:[%s6947_s6 + $0x98] sm:$0xf0] }
 0x145   :  { %2589 = vmatpush.bf16.msrb.mxu0 %v4077_v19  ;;  %2387 = vmatpush.bf16.msra.mxu1 %v4013_v53  ;;  %v4561_v19 = vld [vmem:[%s6947_s6 + $0xb4] sm:$0xf0] }
 0x146   :  { %2415 = vmatpush.bf16.msra.mxu3 %v4017_v35  ;;  %v4165_v62 = vor.u32 %v4561_v19, %v4164_v18  ;;  %v4140_v35 = vld [vmem:[%s6947_s6 + $0x80] sm:$0xf] }
 0x148   :  { %v1999_v42 = vpop.f32.mrf.mxu2  ;;  %v1973_v57 = vpop.f32.mrf.mxu0 }
 0x149   :  { %v1987_v2 = vpop.f32.mrf.mxu1  ;;  %v2013_v31 = vpop.f32.mrf.mxu3  ;;  %v1974_v11 = vadd.f32 %v1973_v57, %v1448_v14  ;;  %v2000_v12 = vadd.f32 %v1999_v42, %v1986_v58  ;;  %2596 = vmatpush.bf16.msrb.mxu1 %v4197_v45 }
 0x14a   :  { %2624 = vmatpush.bf16.msrb.mxu3 %v4201_v52 }
 0x14b   :  { %v1988_v14 = vadd.f32 %v1987_v2, %v1974_v11  ;;  %v2014_v54 = vadd.f32 %v2013_v31, %v2000_v12  ;;  %v4565_v2 = vld [vmem:[%s6947_s6 + $0xd4] sm:$0xf0]  ;;  %v4182_v31 = vld [vmem:[%s6947_s6 + $0xd8] sm:$0xf0]  ;;  %v4173_v11 = vor.u32 %v4563_v9, %v4172_v8  ;;  %v4174_v12 = vld [vmem:[%s6947_s6 + $0xc8] sm:$0xf0] }
 0x14c   :  { %v4181_v5 = vor.u32 %v4565_v2, %v4180_v0  ;;  %v4185_v6 = vor.u32 %v4564_v3, %v4182_v31 }
 0x14d   :  { %2597 = vmatpush.bf16.msrb.mxu1 %v4189_v21 }
 0x14e   :  { %2625 = vmatpush.bf16.msrb.mxu3 %v4193_v60 }
 0x150   :  { %v2001_v25 = vpop.f32.mrf.mxu2 }
 0x151   :  { %v2002_v44 = vadd.f32 %v2001_v25, %v1988_v14  ;;  %v2015_v48 = vpop.f32.mrf.mxu3  ;;  %2598 = vmatpush.bf16.msrb.mxu1 %v4181_v5  ;;  %v4169_v25 = vor.u32 %v4560_v20, %v4166_v22 }
 0x152   :  { %2626 = vmatpush.bf16.msrb.mxu3 %v4185_v6 }
 0x153   :  { %v2016_v58 = vadd.f32 %v2015_v48, %v2002_v44 }
 0x155   :  { %2599 = vmatpush.bf16.msrb.mxu1 %v4173_v11 }
 0x159   :  { %2600 = vmatpush.bf16.msrb.mxu1 %v4165_v62 }
 0x15d   :  { %2601 = vmatpush.bf16.msrb.mxu1 %v4157_v17  ;;  %v2638_v17 = vld [vmem:[%s6949_s8] sm:$0x3] }
 0x160   :  { %v2027_v30 = vpop.f32.mrf.mxu0 }
 0x161   :  { %v2028_v59 = vadd.f32 %v2027_v30, %v2014_v54  ;;  %v2041_v51 = vpop.f32.mrf.mxu1  ;;  %v4558_v30 = vld [vmem:[%s6947_s6 + $0xa4] sm:$0xf] }
 0x162   :  { %v4161_v27 = vor.u32 %v4558_v30, %v4158_v39 }
 0x163   :  { %v2042_v42 = vadd.f32 %v2041_v51, %v2028_v59  ;;  %v4557_v59 = vld [vmem:[%s6947_s6 + $0x94] sm:$0xf0]  ;;  %v4556_v51 = vld [vmem:[%s6947_s6 + $0x94] sm:$0xf] }
 0x164   :  { %v4149_v53 = vor.u32 %v4557_v59, %v4148_v32  ;;  %v4153_v48 = vor.u32 %v4556_v51, %v4150_v40  ;;  %v2640_v32 = vperm.slane %v2638_v17, 0  ;;  %v2641_v59 = vperm.slane %v2638_v17, 1  ;;  %v4603_v17 = vld [vmem:[%s6950_s9 + $0x8] sm:$0xff] }
 0x165   :  { %4621 = vtanh.f32 %v2042_v42 }
 0x166   :  { %4623 = vtanh.f32 %v6381_v61  ;;  %v4562_v61 = vld [vmem:[%s6947_s6 + $0xc4] sm:$0xf]  ;;  %2602 = vmatpush.bf16.msrb.mxu1 %v4149_v53 }
 0x167   :  { %v4177_v13 = vor.u32 %v4562_v61, %v4174_v12 }
 0x168   :  { %v2029_v57 = vpop.f32.mrf.mxu0  ;;  %v2055_v16 = vpop.f32.mrf.mxu2 }
 0x169   :  { %v2030_v24 = vadd.f32 %v2029_v57, %v2016_v58  ;;  %v2043_v63 = vpop.f32.mrf.mxu1  ;;  %2627 = vmatpush.bf16.msrb.mxu3 %v4177_v13  ;;  %v2069_v54 = vpop.f32.mrf.mxu3  ;;  %v2056_v44 = vadd.f32 %v2055_v16, %v1449_v26  ;;  %v4141_v58 = vor.u32 %v4555_v37, %v4140_v35 }
 0x16b   :  { %v6772_v46 = vpop.eup %4621  ;;  %v2044_v47 = vadd.f32 %v2043_v63, %v2030_v24  ;;  %v2070_v45 = vadd.f32 %v2069_v54, %v2056_v44  ;;  %2603 = vmatpush.bf16.msrb.mxu1 %v4141_v58 }
 0x16c   :  { %v2678_v50 = vsub.f32 %v6761_v43, %v6772_v46  ;;  %v6792_v15 = vpop.eup %4623 }
 0x16d   :  { %4625 = vtanh.f32 %v2044_v47  ;;  %v2172_v7 = vpack.c.bf16 %v2044_v47, %v2042_v42  ;;  %2628 = vmatpush.bf16.msrb.mxu3 %v4169_v25 }
 0x16e   :  { %4627 = vtanh.f32 %v6511_v1 }
 0x16f   :  { %2374 = vmatmul.bf16.vlgmr.msra.gmra.mxu0 %v2172_v7  ;;  %2402 = vmatmul.bf16.vlgmr.msra.gmra.mxu2 %v2172_v7 }
 0x170   :  { %v2057_v42 = vpop.f32.mrf.mxu2 }
 0x171   :  { %2629 = vmatpush.bf16.msrb.mxu3 %v4161_v27  ;;  %v2071_v49 = vpop.f32.mrf.mxu3  ;;  %v2058_v21 = vadd.f32 %v2057_v42, %v1449_v26 }
 0x173   :  { %v6803_v14 = vpop.eup %4625  ;;  %v2072_v60 = vadd.f32 %v2071_v49, %v2058_v21 }
 0x174   :  { %v2680_v23 = vsub.f32 %v6792_v15, %v6803_v14 }
 0x175   :  { %2630 = vmatpush.bf16.msrb.mxu3 %v4153_v48 }
 0x179   :  { %2631 = vmatpush.bf16.msrb.mxu3 %v4145_v55 }
 0x17f   :  { %2590 = vmatmul.bf16.vlgmr.msrb.gmra.mxu0 %v6400_v4  ;;  %2618 = vmatmul.bf16.vlgmr.msrb.gmra.mxu2 %v6400_v4  ;;  %v6850_v4 = vpop.eup %4627 }
 0x180   :  { %v2083_v52 = vpop.f32.mrf.mxu0 }
 0x181   :  { %v2084_v10 = vadd.f32 %v2083_v52, %v2070_v45  ;;  %v2097_v56 = vpop.f32.mrf.mxu1 }
 0x183   :  { %v2098_v36 = vadd.f32 %v2097_v56, %v2084_v10 }
 0x188   :  { %v2111_v57 = vpop.f32.mrf.mxu2  ;;  %v2085_v0 = vpop.f32.mrf.mxu0 }
 0x189   :  { %v2112_v24 = vadd.f32 %v2111_v57, %v2098_v36  ;;  %v2125_v63 = vpop.f32.mrf.mxu3  ;;  %v2086_v3 = vadd.f32 %v2085_v0, %v2072_v60  ;;  %v2099_v47 = vpop.f32.mrf.mxu1  ;;  %v4609_v36 = vld [vmem:[%s6950_s9 + $0x38] sm:$0xff]  ;;  %v4608_v60 = vld [vmem:[%s6950_s9 + $0x30] sm:$0xff] }
 0x18a   :  { %v4617_v57 = vld [vmem:[%s6950_s9 + $0x78] sm:$0xff]  ;;  %2824 = vmatpush.bf16.msra.mxu0 %v4609_v36 }
 0x18b   :  { %v2126_v2 = vadd.f32 %v2125_v63, %v2112_v24  ;;  %v2100_v5 = vadd.f32 %v2099_v47, %v2086_v3  ;;  %v4616_v24 = vld [vmem:[%s6950_s9 + $0x70] sm:$0xff] }
 0x18d   :  { %4629 = vtanh.f32 %v2126_v2 }
 0x18e   :  { %4631 = vtanh.f32 %v6528_v33  ;;  %2825 = vmatpush.bf16.msra.mxu0 %v4608_v60 }
 0x190   :  { %v2113_v31 = vpop.f32.mrf.mxu2 }
 0x191   :  { %v2114_v6 = vadd.f32 %v2113_v31, %v2100_v5  ;;  %v2127_v7 = vpop.f32.mrf.mxu3 }
 0x193   :  { %v6852_v8 = vpop.eup %4629  ;;  %v2128_v9 = vadd.f32 %v2127_v7, %v2114_v6 }
 0x194   :  { %v2679_v61 = vsub.f32 %v6850_v4, %v6852_v8  ;;  %v6857_v1 = vpop.eup %4631 }
 0x195   :  { %4633 = vtanh.f32 %v2128_v9  ;;  %v2173_v11 = vpack.c.bf16 %v2128_v9, %v2126_v2 }
 0x197   :  { %2388 = vmatmul.bf16.vlgmr.msra.gmra.mxu1 %v2173_v11  ;;  %2416 = vmatmul.bf16.vlgmr.msra.gmra.mxu3 %v2173_v11 }
 0x198   :  { %2838 = vmatpush.bf16.msra.mxu1 %v4617_v57 }
 0x19b   :  { %v6859_v12 = vpop.eup %4633 }
 0x19c   :  { %v2681_v13 = vsub.f32 %v6857_v1, %v6859_v12  ;;  %2839 = vmatpush.bf16.msra.mxu1 %v4616_v24 }
 0x1a7   :  { %2604 = vmatmul.bf16.vlgmr.msrb.gmra.mxu1 %v6532_v34  ;;  %2632 = vmatmul.bf16.vlgmr.msrb.gmra.mxu3 %v6532_v34 }
 0x1ec   :  { %v2375_v16 = vpop.f32.mrf.mxu0 }
 0x1f2   :  { %v2403_v33 = vpop.f32.mrf.mxu2 }
 0x1f4   :  { %v2377_v19 = vpop.f32.mrf.mxu0 }
 0x1fa   :  { %v2405_v54 = vpop.f32.mrf.mxu2 }
 0x1fc   :  { %v2591_v26 = vpop.f32.mrf.mxu0 }
 0x202   :  { %v2619_v30 = vpop.f32.mrf.mxu2 }
 0x204   :  { %v2593_v37 = vpop.f32.mrf.mxu0 }
 0x20a   :  { %v2621_v45 = vpop.f32.mrf.mxu2 }
 0x214   :  { %v2389_v18 = vpop.f32.mrf.mxu1 }
 0x215   :  { %v2390_v25 = vadd.f32 %v2389_v18, %v2375_v16 }
 0x217   :  { %v2592_v39 = vadd.f32 %v2591_v26, %v2390_v25  ;;  %v4614_v25 = vld [vmem:[%s6950_s9 + $0x60] sm:$0xff]  ;;  %v4605_v26 = vld [vmem:[%s6950_s9 + $0x18] sm:$0xff] }
 0x21a   :  { %v2417_v20 = vpop.f32.mrf.mxu3 }
 0x21b   :  { %v2418_v29 = vadd.f32 %v2417_v20, %v2403_v33 }
 0x21c   :  { %v2391_v62 = vpop.f32.mrf.mxu1 }
 0x21d   :  { %v2620_v34 = vadd.f32 %v2619_v30, %v2418_v29  ;;  %v2392_v44 = vadd.f32 %v2391_v62, %v2377_v19  ;;  %v4615_v62 = vld [vmem:[%s6950_s9 + $0x68] sm:$0xff]  ;;  %v4604_v29 = vld [vmem:[%s6950_s9 + $0x10] sm:$0xff] }
 0x21e   :  { %2840 = vmatpush.bf16.msra.mxu1 %v4615_v62  ;;  %v4612_v30 = vld [vmem:[%s6950_s9 + $0x50] sm:$0xff] }
 0x21f   :  { %v2594_v41 = vadd.f32 %v2593_v37, %v2392_v44 }
 0x222   :  { %v2419_v22 = vpop.f32.mrf.mxu3  ;;  %2841 = vmatpush.bf16.msra.mxu1 %v4614_v25 }
 0x223   :  { %v2420_v40 = vadd.f32 %v2419_v22, %v2405_v54  ;;  %v4607_v54 = vld [vmem:[%s6950_s9 + $0x28] sm:$0xff]  ;;  %v4606_v22 = vld [vmem:[%s6950_s9 + $0x20] sm:$0xff] }
 0x224   :  { %v2605_v28 = vpop.f32.mrf.mxu1  ;;  %2826 = vmatpush.bf16.msra.mxu0 %v4607_v54 }
 0x225   :  { %v2606_v27 = vadd.f32 %v2605_v28, %v2592_v39  ;;  %v2622_v52 = vadd.f32 %v2621_v45, %v2420_v40  ;;  %v4613_v28 = vld [vmem:[%s6950_s9 + $0x58] sm:$0xff]  ;;  %v4611_v39 = vld [vmem:[%s6950_s9 + $0x48] sm:$0xff] }
 0x226   :  { %2842 = vmatpush.bf16.msra.mxu1 %v4613_v28 }
 0x227   :  { %v2644_v48 = vadd.f32 %v2640_v32, %v2606_v27  ;;  %v4602_v27 = vld [vmem:[%s6950_s9] sm:$0xff] }
 0x228   :  { %2827 = vmatpush.bf16.msra.mxu0 %v4606_v22 }
 0x22a   :  { %v2633_v51 = vpop.f32.mrf.mxu3  ;;  %2843 = vmatpush.bf16.msra.mxu1 %v4612_v30 }
 0x22b   :  { %v2634_v53 = vadd.f32 %v2633_v51, %v2620_v34  ;;  %v4610_v34 = vld [vmem:[%s6950_s9 + $0x40] sm:$0xff] }
 0x22c   :  { %v2607_v38 = vpop.f32.mrf.mxu1  ;;  %2828 = vmatpush.bf16.msra.mxu0 %v4605_v26 }
 0x22d   :  { %v2645_v35 = vadd.f32 %v2641_v59, %v2634_v53  ;;  %v2608_v49 = vadd.f32 %v2607_v38, %v2594_v41 }
 0x22e   :  { %2844 = vmatpush.bf16.msra.mxu1 %v4611_v39 }
 0x22f   :  { %v2648_v42 = vmax.f32 %v2644_v48, %v2645_v35  ;;  %v2646_v10 = vadd.f32 %v2640_v32, %v2608_v49 }
 0x230   :  { %2829 = vmatpush.bf16.msra.mxu0 %v4604_v29 }
 0x231   :  { %2649 = vmax.xlane.f32.xlu0 %v2648_v42 }
 0x232   :  { %v2635_v58 = vpop.f32.mrf.mxu3  ;;  %2845 = vmatpush.bf16.msra.mxu1 %v4610_v34 }
 0x233   :  { %v2636_v55 = vadd.f32 %v2635_v58, %v2622_v52 }
 0x234   :  { %2830 = vmatpush.bf16.msra.mxu0 %v4603_v17 }
 0x235   :  { %v2647_v56 = vadd.f32 %v2641_v59, %v2636_v55 }
 0x237   :  { %v2651_v21 = vmax.f32 %v2646_v10, %v2647_v56 }
 0x238   :  { %2831 = vmatpush.bf16.msra.mxu0 %v4602_v27 }
 0x239   :  { %2652 = vmax.xlane.f32.xlu0 %v2651_v21 }
 0x2a4   :  { %v2650_v63 = vpop.xlane.xlu0 %2649 }
 0x2a5   :  { %v2654_v0 = vsub.f32 %v2644_v48, %v2650_v63  ;;  %v2655_v2 = vsub.f32 %v2645_v35, %v2650_v63 }
 0x2a7   :  { %v2658_v3 = vmul.f32 1.442695, %v2654_v0  ;;  %v2660_v47 = vmul.f32 1.442695, %v2655_v2 }
 0x2a9   :  { %4635 = vpow2.f32 %v2658_v3 }
 0x2aa   :  { %4637 = vpow2.f32 %v2660_v47 }
 0x2ac   :  { %v2653_v5 = vpop.xlane.xlu0 %2652 }
 0x2ad   :  { %v2656_v31 = vsub.f32 %v2646_v10, %v2653_v5  ;;  %v2657_v6 = vsub.f32 %v2647_v56, %v2653_v5 }
 0x2af   :  { %v4636_v7 = vpop.eup %4635  ;;  %v2662_v9 = vmul.f32 1.442695, %v2656_v31  ;;  %v2664_v11 = vmul.f32 1.442695, %v2657_v6 }
 0x2b0   :  { %v4638_v16 = vpop.eup %4637 }
 0x2b1   :  { %4639 = vpow2.f32 %v2662_v9  ;;  %v2666_v33 = vadd.f32 %v4638_v16, %v4636_v7 }
 0x2b2   :  { %4641 = vpow2.f32 %v2664_v11 }
 0x2b3   :  { %2667 = vadd.xlane.f32.xlu1 %v2666_v33 }
 0x2b7   :  { %v4640_v18 = vpop.eup %4639 }
 0x2b8   :  { %v4642_v19 = vpop.eup %4641 }
 0x2b9   :  { %v2669_v20 = vadd.f32 %v4642_v19, %v4640_v18 }
 0x2bb   :  { %2670 = vadd.xlane.f32.xlu1 %v2669_v20 }
 0x326   :  { %v2668_v32 = vpop.xlane.xlu1 %2667 }
 0x327   :  { %4643 = vrcp.f32 %v2668_v32 }
 0x32d   :  { %v4644_v59 = vpop.eup %4643 }
 0x32e   :  { %v2674_v51 = vmul.f32 %v4644_v59, %v4636_v7  ;;  %v2675_v44 = vmul.f32 %v4644_v59, %v4638_v16  ;;  %v2671_v53 = vpop.xlane.xlu1 %2670 }
 0x32f   :  { %4645 = vrcp.f32 %v2671_v53 }
 0x330   :  { %v2682_v40 = vmul.f32 %v2678_v50, %v2674_v51  ;;  %v2683_v48 = vmul.f32 %v2679_v61, %v2675_v44 }
 0x332   :  { %v2686_v35 = vadd.f32 %v6772_v46, %v2682_v40  ;;  %v2687_v37 = vadd.f32 %v6852_v8, %v2683_v48  ;;  %v4618_v46 = vld [vmem:[%s6951_s10] ss:$0 sm:$0xff] }
 0x335   :  { %v4646_v38 = vpop.eup %4645 }
 0x336   :  { %v2676_v41 = vmul.f32 %v4646_v38, %v4640_v18  ;;  %v2677_v42 = vmul.f32 %v4646_v38, %v4642_v19 }
 0x338   :  { %v2684_v45 = vmul.f32 %v2680_v23, %v2676_v41  ;;  %v2685_v43 = vmul.f32 %v2681_v13, %v2677_v42 }
 0x33a   :  { %v2688_v50 = vadd.f32 %v6803_v14, %v2684_v45  ;;  %v2689_v4 = vadd.f32 %v6859_v12, %v2685_v43 }
 0x33c   :  { %v2690_v61 = vpack.c.bf16 %v2688_v50, %v2686_v35  ;;  %v2691_v49 = vpack.c.bf16 %v2689_v4, %v2687_v37 }
 0x33e   :  { %2832 = vmatmul.bf16.vlgmr.msra.gmra.mxu0 %v2690_v61  ;;  %2846 = vmatmul.bf16.vlgmr.msra.gmra.mxu1 %v2691_v49 }
 0x3bb   :  { %v2833_v8 = vpop.f32.mrf.mxu0  ;;  %v2847_v52 = vpop.f32.mrf.mxu1 }
 0x3bc   :  { %v2834_v15 = vadd.f32 %v4618_v46, %v2833_v8 }
 0x3be   :  { %v2848_v23 = vadd.f32 %v2847_v52, %v2834_v15 }
 0x3c0   :  { %2852 = vst [vmem:[%s6952_s11] sm:$0xff] %v2848_v23 }
 0x3c3   :  { %v2835_v1 = vpop.f32.mrf.mxu0  ;;  %v2849_v13 = vpop.f32.mrf.mxu1 }
 0x3c4   :  { %v2836_v14 = vadd.f32 %v4618_v46, %v2835_v1 }
 0x3c6   :  { %v2850_v12 = vadd.f32 %v2849_v13, %v2836_v14 }
 0x3c8   :  { %2853 = vst [vmem:[%s6952_s11 + $0x8] sm:$0xff] %v2850_v12 }

</bundles_post_ra>
